<compile_context>
chip_gen: v6e
topology: v6e:2x2x1
jax: 0.10.0
libtpu: 0.0.40
codegen_flags: <defaults>
</compile_context>

<pallas_src>
import math
import jax
import jax.numpy as jnp
from jax.experimental import pallas as pl
from jax.experimental.pallas import tpu as pltpu

# Small config consistent with the module's forward.
N_FEATURES = 4
LATENT_DIM = 32
BATCH = 2
SEQ_LEN = 8


# ---------------------------------------------------------------------------
# Packed parameter layout (single kernel input).
# ---------------------------------------------------------------------------
def _round_up_8(n):
    return ((n + 7) // 8) * 8


def _packed_layout(n_features, latent_dim):
    """Row offsets of each block inside the packed (rows, 4H) parameter buffer.

    Blocks (all 4H lanes wide; row counts padded to multiples of 8 so every
    in-kernel slice starts sublane-aligned):
      enc_wih (F), enc_whh (H), enc_b (1),
      dec_w_eff (H), dec_b_eff (1),        # decoder Linear fused into the cell
      dense_w_pad (H), dense_b_pad (1)     # output projection, padded to 4H lanes
    """
    sizes = (n_features, latent_dim, 1, latent_dim, 1, latent_dim, 1)
    offsets = []
    row = 0
    for s in sizes:
        offsets.append(row)
        row += _round_up_8(s)
    return tuple(offsets), row


def init_params(key, n_features=N_FEATURES, latent_dim=LATENT_DIM):
    """PyTorch-style uniform(-1/sqrt(H), 1/sqrt(H)) init. Weights stored transposed."""
    H, F = latent_dim, n_features
    ks = jax.random.split(key, 10)
    s = 1.0 / math.sqrt(H)

    def u(k, shape):
        return jax.random.uniform(k, shape, jnp.float32, -s, s)

    return dict(
        enc_wih=u(ks[0], (F, 4 * H)),
        enc_whh=u(ks[1], (H, 4 * H)),
        enc_b=u(ks[2], (1, 4 * H)) + u(ks[3], (1, 4 * H)),   # b_ih + b_hh
        dec_wih=u(ks[4], (F, 4 * H)),
        dec_whh=u(ks[5], (H, 4 * H)),
        dec_b=u(ks[6], (1, 4 * H)) + u(ks[7], (1, 4 * H)),   # b_ih + b_hh
        dense_w=u(ks[8], (H, F)),
        dense_b=u(ks[9], (1, F)),
    )


def pack_params(params):
    """One-time param prep: fuse the decoder Linear into the decoder LSTMCell
    input weights and pack everything into a single (rows, 4H) f32 buffer."""
    F, G = params['enc_wih'].shape
    H = G // 4

    # gates = (h @ dense_w + dense_b) @ dec_wih + h @ dec_whh + dec_b
    #       = h @ (dense_w @ dec_wih + dec_whh) + (dense_b @ dec_wih + dec_b)
    dec_w_eff = params['dense_w'] @ params['dec_wih'] + params['dec_whh']   # (H, 4H)
    dec_b_eff = params['dense_b'] @ params['dec_wih'] + params['dec_b']     # (1, 4H)

    dense_w_pad = jnp.zeros((H, G), jnp.float32).at[:, :F].set(params['dense_w'])
    dense_b_pad = jnp.zeros((1, G), jnp.float32).at[:, :F].set(params['dense_b'])

    offs, rows = _packed_layout(F, H)
    blocks = (params['enc_wih'], params['enc_whh'], params['enc_b'],
              dec_w_eff, dec_b_eff, dense_w_pad, dense_b_pad)
    packed = jnp.zeros((rows, G), jnp.float32)
    for off, blk in zip(offs, blocks):
        packed = packed.at[off:off + blk.shape[0], :].set(blk)
    return packed


# ---------------------------------------------------------------------------
# Kernel
# ---------------------------------------------------------------------------
def rae_kernel(x_ref, p_ref, out_ref, h_acc_ref):
    # x_ref:     (B, T, F)   batch-first input, like the PyTorch module
    # p_ref:     (rows, 4H)  packed parameters (see _packed_layout)
    # out_ref:   (B, T, F)
    # h_acc_ref: (B, T, H)   f32 VMEM scratch collecting decoder hidden states
    B, T, F = x_ref.shape
    G = p_ref.shape[1]
    H = G // 4

    offs, _ = _packed_layout(F, H)
    o_ewih, o_ewhh, o_eb, o_dw, o_db, o_yw, o_yb = offs

    # Static, sublane-aligned slices of the single packed parameter tile.
    enc_wih = p_ref[o_ewih:o_ewih + F, :]      # (F, 4H)
    enc_whh = p_ref[o_ewhh:o_ewhh + H, :]      # (H, 4H)
    enc_b = p_ref[o_eb:o_eb + 1, :]            # (1, 4H)
    dec_w = p_ref[o_dw:o_dw + H, :]            # (H, 4H)  fused decoder weight
    dec_b = p_ref[o_db:o_db + 1, :]            # (1, 4H)  fused decoder bias
    dense_w = p_ref[o_yw:o_yw + H, :]          # (H, 4H)  real data in lanes [0, F)
    dense_b = p_ref[o_yb:o_yb + 1, :]          # (1, 4H)

    def lstm_gates(gates, c):
        # Full-width sigmoid/tanh over the (B, 4H) vreg, then static lane slices.
        # PyTorch gate order along 4H: i, f, g, o.
        sg = jax.nn.sigmoid(gates)
        tg = jnp.tanh(gates)
        i_g = sg[:, 0 * H:1 * H]
        f_g = sg[:, 1 * H:2 * H]
        g_g = tg[:, 2 * H:3 * H]
        o_g = sg[:, 3 * H:4 * H]
        c_new = f_g * c + i_g * g_g
        h_new = o_g * jnp.tanh(c_new)
        return h_new, c_new

    # ---- encoder: input projection (+ bias) hoisted out of the recurrence ----
    x_flat = x_ref[...].reshape(B * T, F)
    gx = jnp.dot(x_flat, enc_wih, preferred_element_type=jnp.float32) + enc_b
    gx = gx.reshape(B, T, G)

    h = jnp.zeros((B, H), jnp.float32)
    c = jnp.zeros((B, H), jnp.float32)
    for t in range(T):                       # T static -> fully unrolled
        gates = gx[:, t, :] + jnp.dot(h, enc_whh, preferred_element_type=jnp.float32)
        h, c = lstm_gates(gates, c)

    # ---- decoder: Linear fused into the cell; only one matmul per step ----
    for t in range(T):                       # fully unrolled
        gates = jnp.dot(h, dec_w, preferred_element_type=jnp.float32) + dec_b
        h, c = lstm_gates(gates, c)
        h_acc_ref[:, t, :] = h

    # ---- one batched output projection + single store ----
    h_all = h_acc_ref[...].reshape(B * T, H)
    y = jnp.dot(h_all, dense_w, preferred_element_type=jnp.float32) + dense_b  # (B*T, 4H)
    out_ref[...] = y[:, :F].reshape(B, T, F)


# ---------------------------------------------------------------------------
# Wrapper
# ---------------------------------------------------------------------------
@jax.jit
def recurrent_ae_forward(x, packed_params):
    """x: (B, T, F) float32 batch-first, like the PyTorch module. Returns (B, T, F)."""
    B, T, F = x.shape
    H = packed_params.shape[1] // 4
    vmem = pl.BlockSpec(memory_space=pltpu.MemorySpace.VMEM)
    return pl.pallas_call(
        rae_kernel,
        out_shape=jax.ShapeDtypeStruct((B, T, F), jnp.float32),
        in_specs=[vmem, vmem],
        out_specs=vmem,
        scratch_shapes=[pltpu.VMEM((B, T, H), jnp.float32)],
    )(x, packed_params)


# ---------------------------------------------------------------------------
# Pure-JAX reference (unfused; matches the PyTorch module step-for-step)
# ---------------------------------------------------------------------------
def reference_forward(x, params):
    B, T, F = x.shape
    H = params['enc_whh'].shape[0]

    def cell(x_t, h, c, w_ih, w_hh, b):
        gates = x_t @ w_ih + h @ w_hh + b
        i = jax.nn.sigmoid(gates[:, 0 * H:1 * H])
        f = jax.nn.sigmoid(gates[:, 1 * H:2 * H])
        g = jnp.tanh(gates[:, 2 * H:3 * H])
        o = jax.nn.sigmoid(gates[:, 3 * H:4 * H])
        c_new = f * c + i * g
        return o * jnp.tanh(c_new), c_new

    h = jnp.zeros((B, H), jnp.float32)
    c = jnp.zeros((B, H), jnp.float32)
    for t in range(T):
        h, c = cell(x[:, t, :], h, c,
                    params['enc_wih'], params['enc_whh'], params['enc_b'])

    x_i = h @ params['dense_w'] + params['dense_b']
    outs = []
    for _ in range(T):
        h, c = cell(x_i, h, c,
                    params['dec_wih'], params['dec_whh'], params['dec_b'])
        x_i = h @ params['dense_w'] + params['dense_b']
        outs.append(x_i)
    return jnp.stack(outs, axis=1)


if __name__ == "__main__":
    key = jax.random.PRNGKey(0)
    kx, kp = jax.random.split(key)
    x = jax.random.normal(kx, (BATCH, SEQ_LEN, N_FEATURES), jnp.float32)
    params = init_params(kp)
    packed = pack_params(params)          # one-time: fusion + packing into one buffer

    out = recurrent_ae_forward(x, packed)
    jax.block_until_ready(out)
    assert out.shape == (BATCH, SEQ_LEN, N_FEATURES), out.shape
    assert out.dtype == jnp.float32

    ref = reference_forward(x, params)
    max_err = float(jnp.max(jnp.abs(out - ref)))
    # Weight fusion reorders float adds -> tiny (~ulp-level) differences are expected.
    assert jnp.allclose(out, ref, rtol=1e-4, atol=1e-4), max_err

    print("KERNEL_OK")
</pallas_src>

<mosaic_0001>
module attributes {stable_mosaic.version = 11 : i64} {
  func.func @rae_kernel(%arg0: memref<2x8x4xf32, #tpu.memory_space<vmem>>, %arg1: memref<128x128xf32, #tpu.memory_space<vmem>>, %arg2: memref<2x8x4xf32, #tpu.memory_space<vmem>>, %arg3: memref<2x8x32xf32, #tpu.memory_space<vmem>>) attributes {dimension_semantics = [], scalar_prefetch = 0 : i64, scratch_operands = 1 : i64, tpu.core_type = #tpu.core_type<tc>} {
    %c0 = arith.constant 0 : index
    %c0_0 = arith.constant 0 : index
    %0 = vector.load %arg1[%c0, %c0_0] : memref<128x128xf32, #tpu.memory_space<vmem>>, vector<4x128xf32>
    %c8 = arith.constant 8 : index
    %c0_1 = arith.constant 0 : index
    %1 = vector.load %arg1[%c8, %c0_1] : memref<128x128xf32, #tpu.memory_space<vmem>>, vector<32x128xf32>
    %c40 = arith.constant 40 : index
    %c0_2 = arith.constant 0 : index
    %2 = vector.load %arg1[%c40, %c0_2] : memref<128x128xf32, #tpu.memory_space<vmem>>, vector<1x128xf32>
    %c48 = arith.constant 48 : index
    %c0_3 = arith.constant 0 : index
    %3 = vector.load %arg1[%c48, %c0_3] : memref<128x128xf32, #tpu.memory_space<vmem>>, vector<32x128xf32>
    %c80 = arith.constant 80 : index
    %c0_4 = arith.constant 0 : index
    %4 = vector.load %arg1[%c80, %c0_4] : memref<128x128xf32, #tpu.memory_space<vmem>>, vector<1x128xf32>
    %c88 = arith.constant 88 : index
    %c0_5 = arith.constant 0 : index
    %5 = vector.load %arg1[%c88, %c0_5] : memref<128x128xf32, #tpu.memory_space<vmem>>, vector<32x128xf32>
    %c120 = arith.constant 120 : index
    %c0_6 = arith.constant 0 : index
    %6 = vector.load %arg1[%c120, %c0_6] : memref<128x128xf32, #tpu.memory_space<vmem>>, vector<1x128xf32>
    %c0_7 = arith.constant 0 : index
    %c0_8 = arith.constant 0 : index
    %c0_9 = arith.constant 0 : index
    %7 = vector.load %arg0[%c0_7, %c0_8, %c0_9] : memref<2x8x4xf32, #tpu.memory_space<vmem>>, vector<2x8x4xf32>
    %8 = vector.shape_cast %7 : vector<2x8x4xf32> to vector<16x4xf32>
    %cst = arith.constant dense<0.000000e+00> : vector<16x128xf32>
    %9 = tpu.matmul %8, %0, %cst {dimension_numbers = #tpu.dot_dimension_numbers<[1], [0], [0], [1], [0, 0, 1, 1], [], []>} : vector<16x4xf32>, vector<4x128xf32>, vector<16x128xf32> -> vector<16x128xf32>
    %10 = vector.broadcast %2 : vector<1x128xf32> to vector<16x128xf32>
    %11 = arith.addf %9, %10 : vector<16x128xf32>
    %12 = vector.shape_cast %11 : vector<16x128xf32> to vector<2x8x128xf32>
    %cst_10 = arith.constant 0.000000e+00 : f32
    %13 = vector.broadcast %cst_10 : f32 to vector<2x32xf32>
    %cst_11 = arith.constant 0.000000e+00 : f32
    %14 = vector.broadcast %cst_11 : f32 to vector<2x32xf32>
    %15 = vector.extract_strided_slice %12 {offsets = [0, 0, 0], sizes = [2, 1, 128], strides = [1, 1, 1]} : vector<2x8x128xf32> to vector<2x1x128xf32>
    %16 = vector.shape_cast %15 : vector<2x1x128xf32> to vector<2x128xf32>
    %cst_12 = arith.constant dense<0.000000e+00> : vector<2x128xf32>
    %17 = tpu.matmul %13, %1, %cst_12 {dimension_numbers = #tpu.dot_dimension_numbers<[1], [0], [0], [1], [0, 0, 1, 1], [], []>} : vector<2x32xf32>, vector<32x128xf32>, vector<2x128xf32> -> vector<2x128xf32>
    %18 = arith.addf %16, %17 : vector<2x128xf32>
    %19 = arith.negf %18 : vector<2x128xf32>
    %20 = math.exp %19 : vector<2x128xf32>
    %cst_13 = arith.constant 1.000000e+00 : f32
    %21 = vector.broadcast %cst_13 : f32 to vector<2x128xf32>
    %22 = arith.addf %21, %20 : vector<2x128xf32>
    %23 = arith.divf %21, %22 : vector<2x128xf32>
    %24 = math.tanh %18 : vector<2x128xf32>
    %25 = vector.extract_strided_slice %23 {offsets = [0, 0], sizes = [2, 32], strides = [1, 1]} : vector<2x128xf32> to vector<2x32xf32>
    %26 = vector.extract_strided_slice %23 {offsets = [0, 32], sizes = [2, 32], strides = [1, 1]} : vector<2x128xf32> to vector<2x32xf32>
    %27 = vector.extract_strided_slice %24 {offsets = [0, 64], sizes = [2, 32], strides = [1, 1]} : vector<2x128xf32> to vector<2x32xf32>
    %28 = vector.extract_strided_slice %23 {offsets = [0, 96], sizes = [2, 32], strides = [1, 1]} : vector<2x128xf32> to vector<2x32xf32>
    %29 = arith.mulf %26, %14 : vector<2x32xf32>
    %30 = arith.mulf %25, %27 : vector<2x32xf32>
    %31 = arith.addf %29, %30 : vector<2x32xf32>
    %32 = math.tanh %31 : vector<2x32xf32>
    %33 = arith.mulf %28, %32 : vector<2x32xf32>
    %34 = vector.extract_strided_slice %12 {offsets = [0, 1, 0], sizes = [2, 1, 128], strides = [1, 1, 1]} : vector<2x8x128xf32> to vector<2x1x128xf32>
    %35 = vector.shape_cast %34 : vector<2x1x128xf32> to vector<2x128xf32>
    %cst_14 = arith.constant dense<0.000000e+00> : vector<2x128xf32>
    %36 = tpu.matmul %33, %1, %cst_14 {dimension_numbers = #tpu.dot_dimension_numbers<[1], [0], [0], [1], [0, 0, 1, 1], [], []>} : vector<2x32xf32>, vector<32x128xf32>, vector<2x128xf32> -> vector<2x128xf32>
    %37 = arith.addf %35, %36 : vector<2x128xf32>
    %38 = arith.negf %37 : vector<2x128xf32>
    %39 = math.exp %38 : vector<2x128xf32>
    %cst_15 = arith.constant 1.000000e+00 : f32
    %40 = vector.broadcast %cst_15 : f32 to vector<2x128xf32>
    %41 = arith.addf %40, %39 : vector<2x128xf32>
    %42 = arith.divf %40, %41 : vector<2x128xf32>
    %43 = math.tanh %37 : vector<2x128xf32>
    %44 = vector.extract_strided_slice %42 {offsets = [0, 0], sizes = [2, 32], strides = [1, 1]} : vector<2x128xf32> to vector<2x32xf32>
    %45 = vector.extract_strided_slice %42 {offsets = [0, 32], sizes = [2, 32], strides = [1, 1]} : vector<2x128xf32> to vector<2x32xf32>
    %46 = vector.extract_strided_slice %43 {offsets = [0, 64], sizes = [2, 32], strides = [1, 1]} : vector<2x128xf32> to vector<2x32xf32>
    %47 = vector.extract_strided_slice %42 {offsets = [0, 96], sizes = [2, 32], strides = [1, 1]} : vector<2x128xf32> to vector<2x32xf32>
    %48 = arith.mulf %45, %31 : vector<2x32xf32>
    %49 = arith.mulf %44, %46 : vector<2x32xf32>
    %50 = arith.addf %48, %49 : vector<2x32xf32>
    %51 = math.tanh %50 : vector<2x32xf32>
    %52 = arith.mulf %47, %51 : vector<2x32xf32>
    %53 = vector.extract_strided_slice %12 {offsets = [0, 2, 0], sizes = [2, 1, 128], strides = [1, 1, 1]} : vector<2x8x128xf32> to vector<2x1x128xf32>
    %54 = vector.shape_cast %53 : vector<2x1x128xf32> to vector<2x128xf32>
    %cst_16 = arith.constant dense<0.000000e+00> : vector<2x128xf32>
    %55 = tpu.matmul %52, %1, %cst_16 {dimension_numbers = #tpu.dot_dimension_numbers<[1], [0], [0], [1], [0, 0, 1, 1], [], []>} : vector<2x32xf32>, vector<32x128xf32>, vector<2x128xf32> -> vector<2x128xf32>
    %56 = arith.addf %54, %55 : vector<2x128xf32>
    %57 = arith.negf %56 : vector<2x128xf32>
    %58 = math.exp %57 : vector<2x128xf32>
    %cst_17 = arith.constant 1.000000e+00 : f32
    %59 = vector.broadcast %cst_17 : f32 to vector<2x128xf32>
    %60 = arith.addf %59, %58 : vector<2x128xf32>
    %61 = arith.divf %59, %60 : vector<2x128xf32>
    %62 = math.tanh %56 : vector<2x128xf32>
    %63 = vector.extract_strided_slice %61 {offsets = [0, 0], sizes = [2, 32], strides = [1, 1]} : vector<2x128xf32> to vector<2x32xf32>
    %64 = vector.extract_strided_slice %61 {offsets = [0, 32], sizes = [2, 32], strides = [1, 1]} : vector<2x128xf32> to vector<2x32xf32>
    %65 = vector.extract_strided_slice %62 {offsets = [0, 64], sizes = [2, 32], strides = [1, 1]} : vector<2x128xf32> to vector<2x32xf32>
    %66 = vector.extract_strided_slice %61 {offsets = [0, 96], sizes = [2, 32], strides = [1, 1]} : vector<2x128xf32> to vector<2x32xf32>
    %67 = arith.mulf %64, %50 : vector<2x32xf32>
    %68 = arith.mulf %63, %65 : vector<2x32xf32>
    %69 = arith.addf %67, %68 : vector<2x32xf32>
    %70 = math.tanh %69 : vector<2x32xf32>
    %71 = arith.mulf %66, %70 : vector<2x32xf32>
    %72 = vector.extract_strided_slice %12 {offsets = [0, 3, 0], sizes = [2, 1, 128], strides = [1, 1, 1]} : vector<2x8x128xf32> to vector<2x1x128xf32>
    %73 = vector.shape_cast %72 : vector<2x1x128xf32> to vector<2x128xf32>
    %cst_18 = arith.constant dense<0.000000e+00> : vector<2x128xf32>
    %74 = tpu.matmul %71, %1, %cst_18 {dimension_numbers = #tpu.dot_dimension_numbers<[1], [0], [0], [1], [0, 0, 1, 1], [], []>} : vector<2x32xf32>, vector<32x128xf32>, vector<2x128xf32> -> vector<2x128xf32>
    %75 = arith.addf %73, %74 : vector<2x128xf32>
    %76 = arith.negf %75 : vector<2x128xf32>
    %77 = math.exp %76 : vector<2x128xf32>
    %cst_19 = arith.constant 1.000000e+00 : f32
    %78 = vector.broadcast %cst_19 : f32 to vector<2x128xf32>
    %79 = arith.addf %78, %77 : vector<2x128xf32>
    %80 = arith.divf %78, %79 : vector<2x128xf32>
    %81 = math.tanh %75 : vector<2x128xf32>
    %82 = vector.extract_strided_slice %80 {offsets = [0, 0], sizes = [2, 32], strides = [1, 1]} : vector<2x128xf32> to vector<2x32xf32>
    %83 = vector.extract_strided_slice %80 {offsets = [0, 32], sizes = [2, 32], strides = [1, 1]} : vector<2x128xf32> to vector<2x32xf32>
    %84 = vector.extract_strided_slice %81 {offsets = [0, 64], sizes = [2, 32], strides = [1, 1]} : vector<2x128xf32> to vector<2x32xf32>
    %85 = vector.extract_strided_slice %80 {offsets = [0, 96], sizes = [2, 32], strides = [1, 1]} : vector<2x128xf32> to vector<2x32xf32>
    %86 = arith.mulf %83, %69 : vector<2x32xf32>
    %87 = arith.mulf %82, %84 : vector<2x32xf32>
    %88 = arith.addf %86, %87 : vector<2x32xf32>
    %89 = math.tanh %88 : vector<2x32xf32>
    %90 = arith.mulf %85, %89 : vector<2x32xf32>
    %91 = vector.extract_strided_slice %12 {offsets = [0, 4, 0], sizes = [2, 1, 128], strides = [1, 1, 1]} : vector<2x8x128xf32> to vector<2x1x128xf32>
    %92 = vector.shape_cast %91 : vector<2x1x128xf32> to vector<2x128xf32>
    %cst_20 = arith.constant dense<0.000000e+00> : vector<2x128xf32>
    %93 = tpu.matmul %90, %1, %cst_20 {dimension_numbers = #tpu.dot_dimension_numbers<[1], [0], [0], [1], [0, 0, 1, 1], [], []>} : vector<2x32xf32>, vector<32x128xf32>, vector<2x128xf32> -> vector<2x128xf32>
    %94 = arith.addf %92, %93 : vector<2x128xf32>
    %95 = arith.negf %94 : vector<2x128xf32>
    %96 = math.exp %95 : vector<2x128xf32>
    %cst_21 = arith.constant 1.000000e+00 : f32
    %97 = vector.broadcast %cst_21 : f32 to vector<2x128xf32>
    %98 = arith.addf %97, %96 : vector<2x128xf32>
    %99 = arith.divf %97, %98 : vector<2x128xf32>
    %100 = math.tanh %94 : vector<2x128xf32>
    %101 = vector.extract_strided_slice %99 {offsets = [0, 0], sizes = [2, 32], strides = [1, 1]} : vector<2x128xf32> to vector<2x32xf32>
    %102 = vector.extract_strided_slice %99 {offsets = [0, 32], sizes = [2, 32], strides = [1, 1]} : vector<2x128xf32> to vector<2x32xf32>
    %103 = vector.extract_strided_slice %100 {offsets = [0, 64], sizes = [2, 32], strides = [1, 1]} : vector<2x128xf32> to vector<2x32xf32>
    %104 = vector.extract_strided_slice %99 {offsets = [0, 96], sizes = [2, 32], strides = [1, 1]} : vector<2x128xf32> to vector<2x32xf32>
    %105 = arith.mulf %102, %88 : vector<2x32xf32>
    %106 = arith.mulf %101, %103 : vector<2x32xf32>
    %107 = arith.addf %105, %106 : vector<2x32xf32>
    %108 = math.tanh %107 : vector<2x32xf32>
    %109 = arith.mulf %104, %108 : vector<2x32xf32>
    %110 = vector.extract_strided_slice %12 {offsets = [0, 5, 0], sizes = [2, 1, 128], strides = [1, 1, 1]} : vector<2x8x128xf32> to vector<2x1x128xf32>
    %111 = vector.shape_cast %110 : vector<2x1x128xf32> to vector<2x128xf32>
    %cst_22 = arith.constant dense<0.000000e+00> : vector<2x128xf32>
    %112 = tpu.matmul %109, %1, %cst_22 {dimension_numbers = #tpu.dot_dimension_numbers<[1], [0], [0], [1], [0, 0, 1, 1], [], []>} : vector<2x32xf32>, vector<32x128xf32>, vector<2x128xf32> -> vector<2x128xf32>
    %113 = arith.addf %111, %112 : vector<2x128xf32>
    %114 = arith.negf %113 : vector<2x128xf32>
    %115 = math.exp %114 : vector<2x128xf32>
    %cst_23 = arith.constant 1.000000e+00 : f32
    %116 = vector.broadcast %cst_23 : f32 to vector<2x128xf32>
    %117 = arith.addf %116, %115 : vector<2x128xf32>
    %118 = arith.divf %116, %117 : vector<2x128xf32>
    %119 = math.tanh %113 : vector<2x128xf32>
    %120 = vector.extract_strided_slice %118 {offsets = [0, 0], sizes = [2, 32], strides = [1, 1]} : vector<2x128xf32> to vector<2x32xf32>
    %121 = vector.extract_strided_slice %118 {offsets = [0, 32], sizes = [2, 32], strides = [1, 1]} : vector<2x128xf32> to vector<2x32xf32>
    %122 = vector.extract_strided_slice %119 {offsets = [0, 64], sizes = [2, 32], strides = [1, 1]} : vector<2x128xf32> to vector<2x32xf32>
    %123 = vector.extract_strided_slice %118 {offsets = [0, 96], sizes = [2, 32], strides = [1, 1]} : vector<2x128xf32> to vector<2x32xf32>
    %124 = arith.mulf %121, %107 : vector<2x32xf32>
    %125 = arith.mulf %120, %122 : vector<2x32xf32>
    %126 = arith.addf %124, %125 : vector<2x32xf32>
    %127 = math.tanh %126 : vector<2x32xf32>
    %128 = arith.mulf %123, %127 : vector<2x32xf32>
    %129 = vector.extract_strided_slice %12 {offsets = [0, 6, 0], sizes = [2, 1, 128], strides = [1, 1, 1]} : vector<2x8x128xf32> to vector<2x1x128xf32>
    %130 = vector.shape_cast %129 : vector<2x1x128xf32> to vector<2x128xf32>
    %cst_24 = arith.constant dense<0.000000e+00> : vector<2x128xf32>
    %131 = tpu.matmul %128, %1, %cst_24 {dimension_numbers = #tpu.dot_dimension_numbers<[1], [0], [0], [1], [0, 0, 1, 1], [], []>} : vector<2x32xf32>, vector<32x128xf32>, vector<2x128xf32> -> vector<2x128xf32>
    %132 = arith.addf %130, %131 : vector<2x128xf32>
    %133 = arith.negf %132 : vector<2x128xf32>
    %134 = math.exp %133 : vector<2x128xf32>
    %cst_25 = arith.constant 1.000000e+00 : f32
    %135 = vector.broadcast %cst_25 : f32 to vector<2x128xf32>
    %136 = arith.addf %135, %134 : vector<2x128xf32>
    %137 = arith.divf %135, %136 : vector<2x128xf32>
    %138 = math.tanh %132 : vector<2x128xf32>
    %139 = vector.extract_strided_slice %137 {offsets = [0, 0], sizes = [2, 32], strides = [1, 1]} : vector<2x128xf32> to vector<2x32xf32>
    %140 = vector.extract_strided_slice %137 {offsets = [0, 32], sizes = [2, 32], strides = [1, 1]} : vector<2x128xf32> to vector<2x32xf32>
    %141 = vector.extract_strided_slice %138 {offsets = [0, 64], sizes = [2, 32], strides = [1, 1]} : vector<2x128xf32> to vector<2x32xf32>
    %142 = vector.extract_strided_slice %137 {offsets = [0, 96], sizes = [2, 32], strides = [1, 1]} : vector<2x128xf32> to vector<2x32xf32>
    %143 = arith.mulf %140, %126 : vector<2x32xf32>
    %144 = arith.mulf %139, %141 : vector<2x32xf32>
    %145 = arith.addf %143, %144 : vector<2x32xf32>
    %146 = math.tanh %145 : vector<2x32xf32>
    %147 = arith.mulf %142, %146 : vector<2x32xf32>
    %148 = vector.extract_strided_slice %12 {offsets = [0, 7, 0], sizes = [2, 1, 128], strides = [1, 1, 1]} : vector<2x8x128xf32> to vector<2x1x128xf32>
    %149 = vector.shape_cast %148 : vector<2x1x128xf32> to vector<2x128xf32>
    %cst_26 = arith.constant dense<0.000000e+00> : vector<2x128xf32>
    %150 = tpu.matmul %147, %1, %cst_26 {dimension_numbers = #tpu.dot_dimension_numbers<[1], [0], [0], [1], [0, 0, 1, 1], [], []>} : vector<2x32xf32>, vector<32x128xf32>, vector<2x128xf32> -> vector<2x128xf32>
    %151 = arith.addf %149, %150 : vector<2x128xf32>
    %152 = arith.negf %151 : vector<2x128xf32>
    %153 = math.exp %152 : vector<2x128xf32>
    %cst_27 = arith.constant 1.000000e+00 : f32
    %154 = vector.broadcast %cst_27 : f32 to vector<2x128xf32>
    %155 = arith.addf %154, %153 : vector<2x128xf32>
    %156 = arith.divf %154, %155 : vector<2x128xf32>
    %157 = math.tanh %151 : vector<2x128xf32>
    %158 = vector.extract_strided_slice %156 {offsets = [0, 0], sizes = [2, 32], strides = [1, 1]} : vector<2x128xf32> to vector<2x32xf32>
    %159 = vector.extract_strided_slice %156 {offsets = [0, 32], sizes = [2, 32], strides = [1, 1]} : vector<2x128xf32> to vector<2x32xf32>
    %160 = vector.extract_strided_slice %157 {offsets = [0, 64], sizes = [2, 32], strides = [1, 1]} : vector<2x128xf32> to vector<2x32xf32>
    %161 = vector.extract_strided_slice %156 {offsets = [0, 96], sizes = [2, 32], strides = [1, 1]} : vector<2x128xf32> to vector<2x32xf32>
    %162 = arith.mulf %159, %145 : vector<2x32xf32>
    %163 = arith.mulf %158, %160 : vector<2x32xf32>
    %164 = arith.addf %162, %163 : vector<2x32xf32>
    %165 = math.tanh %164 : vector<2x32xf32>
    %166 = arith.mulf %161, %165 : vector<2x32xf32>
    %cst_28 = arith.constant dense<0.000000e+00> : vector<2x128xf32>
    %167 = tpu.matmul %166, %3, %cst_28 {dimension_numbers = #tpu.dot_dimension_numbers<[1], [0], [0], [1], [0, 0, 1, 1], [], []>} : vector<2x32xf32>, vector<32x128xf32>, vector<2x128xf32> -> vector<2x128xf32>
    %168 = vector.broadcast %4 : vector<1x128xf32> to vector<2x128xf32>
    %169 = arith.addf %167, %168 : vector<2x128xf32>
    %170 = arith.negf %169 : vector<2x128xf32>
    %171 = math.exp %170 : vector<2x128xf32>
    %cst_29 = arith.constant 1.000000e+00 : f32
    %172 = vector.broadcast %cst_29 : f32 to vector<2x128xf32>
    %173 = arith.addf %172, %171 : vector<2x128xf32>
    %174 = arith.divf %172, %173 : vector<2x128xf32>
    %175 = math.tanh %169 : vector<2x128xf32>
    %176 = vector.extract_strided_slice %174 {offsets = [0, 0], sizes = [2, 32], strides = [1, 1]} : vector<2x128xf32> to vector<2x32xf32>
    %177 = vector.extract_strided_slice %174 {offsets = [0, 32], sizes = [2, 32], strides = [1, 1]} : vector<2x128xf32> to vector<2x32xf32>
    %178 = vector.extract_strided_slice %175 {offsets = [0, 64], sizes = [2, 32], strides = [1, 1]} : vector<2x128xf32> to vector<2x32xf32>
    %179 = vector.extract_strided_slice %174 {offsets = [0, 96], sizes = [2, 32], strides = [1, 1]} : vector<2x128xf32> to vector<2x32xf32>
    %180 = arith.mulf %177, %164 : vector<2x32xf32>
    %181 = arith.mulf %176, %178 : vector<2x32xf32>
    %182 = arith.addf %180, %181 : vector<2x32xf32>
    %183 = math.tanh %182 : vector<2x32xf32>
    %184 = arith.mulf %179, %183 : vector<2x32xf32>
    %c0_30 = arith.constant 0 : index
    %c0_31 = arith.constant 0 : index
    %c0_32 = arith.constant 0 : index
    %185 = vector.load %arg3[%c0_30, %c0_31, %c0_32] : memref<2x8x32xf32, #tpu.memory_space<vmem>>, vector<2x1x32xf32>
    %186 = vector.shape_cast %185 : vector<2x1x32xf32> to vector<2x32xf32>
    %187 = vector.shape_cast %184 : vector<2x32xf32> to vector<2x1x32xf32>
    tpu.vector_store %arg3[%c0_30, %c0_31, %c0_32], %187 {strides = array<i32>} : memref<2x8x32xf32, #tpu.memory_space<vmem>>, vector<2x1x32xf32>,
    %cst_33 = arith.constant dense<0.000000e+00> : vector<2x128xf32>
    %188 = tpu.matmul %184, %3, %cst_33 {dimension_numbers = #tpu.dot_dimension_numbers<[1], [0], [0], [1], [0, 0, 1, 1], [], []>} : vector<2x32xf32>, vector<32x128xf32>, vector<2x128xf32> -> vector<2x128xf32>
    %189 = vector.broadcast %4 : vector<1x128xf32> to vector<2x128xf32>
    %190 = arith.addf %188, %189 : vector<2x128xf32>
    %191 = arith.negf %190 : vector<2x128xf32>
    %192 = math.exp %191 : vector<2x128xf32>
    %cst_34 = arith.constant 1.000000e+00 : f32
    %193 = vector.broadcast %cst_34 : f32 to vector<2x128xf32>
    %194 = arith.addf %193, %192 : vector<2x128xf32>
    %195 = arith.divf %193, %194 : vector<2x128xf32>
    %196 = math.tanh %190 : vector<2x128xf32>
    %197 = vector.extract_strided_slice %195 {offsets = [0, 0], sizes = [2, 32], strides = [1, 1]} : vector<2x128xf32> to vector<2x32xf32>
    %198 = vector.extract_strided_slice %195 {offsets = [0, 32], sizes = [2, 32], strides = [1, 1]} : vector<2x128xf32> to vector<2x32xf32>
    %199 = vector.extract_strided_slice %196 {offsets = [0, 64], sizes = [2, 32], strides = [1, 1]} : vector<2x128xf32> to vector<2x32xf32>
    %200 = vector.extract_strided_slice %195 {offsets = [0, 96], sizes = [2, 32], strides = [1, 1]} : vector<2x128xf32> to vector<2x32xf32>
    %201 = arith.mulf %198, %182 : vector<2x32xf32>
    %202 = arith.mulf %197, %199 : vector<2x32xf32>
    %203 = arith.addf %201, %202 : vector<2x32xf32>
    %204 = math.tanh %203 : vector<2x32xf32>
    %205 = arith.mulf %200, %204 : vector<2x32xf32>
    %c0_35 = arith.constant 0 : index
    %c1 = arith.constant 1 : index
    %c0_36 = arith.constant 0 : index
    %206 = vector.load %arg3[%c0_35, %c1, %c0_36] : memref<2x8x32xf32, #tpu.memory_space<vmem>>, vector<2x1x32xf32>
    %207 = vector.shape_cast %206 : vector<2x1x32xf32> to vector<2x32xf32>
    %208 = vector.shape_cast %205 : vector<2x32xf32> to vector<2x1x32xf32>
    tpu.vector_store %arg3[%c0_35, %c1, %c0_36], %208 {strides = array<i32>} : memref<2x8x32xf32, #tpu.memory_space<vmem>>, vector<2x1x32xf32>,
    %cst_37 = arith.constant dense<0.000000e+00> : vector<2x128xf32>
    %209 = tpu.matmul %205, %3, %cst_37 {dimension_numbers = #tpu.dot_dimension_numbers<[1], [0], [0], [1], [0, 0, 1, 1], [], []>} : vector<2x32xf32>, vector<32x128xf32>, vector<2x128xf32> -> vector<2x128xf32>
    %210 = vector.broadcast %4 : vector<1x128xf32> to vector<2x128xf32>
    %211 = arith.addf %209, %210 : vector<2x128xf32>
    %212 = arith.negf %211 : vector<2x128xf32>
    %213 = math.exp %212 : vector<2x128xf32>
    %cst_38 = arith.constant 1.000000e+00 : f32
    %214 = vector.broadcast %cst_38 : f32 to vector<2x128xf32>
    %215 = arith.addf %214, %213 : vector<2x128xf32>
    %216 = arith.divf %214, %215 : vector<2x128xf32>
    %217 = math.tanh %211 : vector<2x128xf32>
    %218 = vector.extract_strided_slice %216 {offsets = [0, 0], sizes = [2, 32], strides = [1, 1]} : vector<2x128xf32> to vector<2x32xf32>
    %219 = vector.extract_strided_slice %216 {offsets = [0, 32], sizes = [2, 32], strides = [1, 1]} : vector<2x128xf32> to vector<2x32xf32>
    %220 = vector.extract_strided_slice %217 {offsets = [0, 64], sizes = [2, 32], strides = [1, 1]} : vector<2x128xf32> to vector<2x32xf32>
    %221 = vector.extract_strided_slice %216 {offsets = [0, 96], sizes = [2, 32], strides = [1, 1]} : vector<2x128xf32> to vector<2x32xf32>
    %222 = arith.mulf %219, %203 : vector<2x32xf32>
    %223 = arith.mulf %218, %220 : vector<2x32xf32>
    %224 = arith.addf %222, %223 : vector<2x32xf32>
    %225 = math.tanh %224 : vector<2x32xf32>
    %226 = arith.mulf %221, %225 : vector<2x32xf32>
    %c0_39 = arith.constant 0 : index
    %c2 = arith.constant 2 : index
    %c0_40 = arith.constant 0 : index
    %227 = vector.load %arg3[%c0_39, %c2, %c0_40] : memref<2x8x32xf32, #tpu.memory_space<vmem>>, vector<2x1x32xf32>
    %228 = vector.shape_cast %227 : vector<2x1x32xf32> to vector<2x32xf32>
    %229 = vector.shape_cast %226 : vector<2x32xf32> to vector<2x1x32xf32>
    tpu.vector_store %arg3[%c0_39, %c2, %c0_40], %229 {strides = array<i32>} : memref<2x8x32xf32, #tpu.memory_space<vmem>>, vector<2x1x32xf32>,
    %cst_41 = arith.constant dense<0.000000e+00> : vector<2x128xf32>
    %230 = tpu.matmul %226, %3, %cst_41 {dimension_numbers = #tpu.dot_dimension_numbers<[1], [0], [0], [1], [0, 0, 1, 1], [], []>} : vector<2x32xf32>, vector<32x128xf32>, vector<2x128xf32> -> vector<2x128xf32>
    %231 = vector.broadcast %4 : vector<1x128xf32> to vector<2x128xf32>
    %232 = arith.addf %230, %231 : vector<2x128xf32>
    %233 = arith.negf %232 : vector<2x128xf32>
    %234 = math.exp %233 : vector<2x128xf32>
    %cst_42 = arith.constant 1.000000e+00 : f32
    %235 = vector.broadcast %cst_42 : f32 to vector<2x128xf32>
    %236 = arith.addf %235, %234 : vector<2x128xf32>
    %237 = arith.divf %235, %236 : vector<2x128xf32>
    %238 = math.tanh %232 : vector<2x128xf32>
    %239 = vector.extract_strided_slice %237 {offsets = [0, 0], sizes = [2, 32], strides = [1, 1]} : vector<2x128xf32> to vector<2x32xf32>
    %240 = vector.extract_strided_slice %237 {offsets = [0, 32], sizes = [2, 32], strides = [1, 1]} : vector<2x128xf32> to vector<2x32xf32>
    %241 = vector.extract_strided_slice %238 {offsets = [0, 64], sizes = [2, 32], strides = [1, 1]} : vector<2x128xf32> to vector<2x32xf32>
    %242 = vector.extract_strided_slice %237 {offsets = [0, 96], sizes = [2, 32], strides = [1, 1]} : vector<2x128xf32> to vector<2x32xf32>
    %243 = arith.mulf %240, %224 : vector<2x32xf32>
    %244 = arith.mulf %239, %241 : vector<2x32xf32>
    %245 = arith.addf %243, %244 : vector<2x32xf32>
    %246 = math.tanh %245 : vector<2x32xf32>
    %247 = arith.mulf %242, %246 : vector<2x32xf32>
    %c0_43 = arith.constant 0 : index
    %c3 = arith.constant 3 : index
    %c0_44 = arith.constant 0 : index
    %248 = vector.load %arg3[%c0_43, %c3, %c0_44] : memref<2x8x32xf32, #tpu.memory_space<vmem>>, vector<2x1x32xf32>
    %249 = vector.shape_cast %248 : vector<2x1x32xf32> to vector<2x32xf32>
    %250 = vector.shape_cast %247 : vector<2x32xf32> to vector<2x1x32xf32>
    tpu.vector_store %arg3[%c0_43, %c3, %c0_44], %250 {strides = array<i32>} : memref<2x8x32xf32, #tpu.memory_space<vmem>>, vector<2x1x32xf32>,
    %cst_45 = arith.constant dense<0.000000e+00> : vector<2x128xf32>
    %251 = tpu.matmul %247, %3, %cst_45 {dimension_numbers = #tpu.dot_dimension_numbers<[1], [0], [0], [1], [0, 0, 1, 1], [], []>} : vector<2x32xf32>, vector<32x128xf32>, vector<2x128xf32> -> vector<2x128xf32>
    %252 = vector.broadcast %4 : vector<1x128xf32> to vector<2x128xf32>
    %253 = arith.addf %251, %252 : vector<2x128xf32>
    %254 = arith.negf %253 : vector<2x128xf32>
    %255 = math.exp %254 : vector<2x128xf32>
    %cst_46 = arith.constant 1.000000e+00 : f32
    %256 = vector.broadcast %cst_46 : f32 to vector<2x128xf32>
    %257 = arith.addf %256, %255 : vector<2x128xf32>
    %258 = arith.divf %256, %257 : vector<2x128xf32>
    %259 = math.tanh %253 : vector<2x128xf32>
    %260 = vector.extract_strided_slice %258 {offsets = [0, 0], sizes = [2, 32], strides = [1, 1]} : vector<2x128xf32> to vector<2x32xf32>
    %261 = vector.extract_strided_slice %258 {offsets = [0, 32], sizes = [2, 32], strides = [1, 1]} : vector<2x128xf32> to vector<2x32xf32>
    %262 = vector.extract_strided_slice %259 {offsets = [0, 64], sizes = [2, 32], strides = [1, 1]} : vector<2x128xf32> to vector<2x32xf32>
    %263 = vector.extract_strided_slice %258 {offsets = [0, 96], sizes = [2, 32], strides = [1, 1]} : vector<2x128xf32> to vector<2x32xf32>
    %264 = arith.mulf %261, %245 : vector<2x32xf32>
    %265 = arith.mulf %260, %262 : vector<2x32xf32>
    %266 = arith.addf %264, %265 : vector<2x32xf32>
    %267 = math.tanh %266 : vector<2x32xf32>
    %268 = arith.mulf %263, %267 : vector<2x32xf32>
    %c0_47 = arith.constant 0 : index
    %c4 = arith.constant 4 : index
    %c0_48 = arith.constant 0 : index
    %269 = vector.load %arg3[%c0_47, %c4, %c0_48] : memref<2x8x32xf32, #tpu.memory_space<vmem>>, vector<2x1x32xf32>
    %270 = vector.shape_cast %269 : vector<2x1x32xf32> to vector<2x32xf32>
    %271 = vector.shape_cast %268 : vector<2x32xf32> to vector<2x1x32xf32>
    tpu.vector_store %arg3[%c0_47, %c4, %c0_48], %271 {strides = array<i32>} : memref<2x8x32xf32, #tpu.memory_space<vmem>>, vector<2x1x32xf32>,
    %cst_49 = arith.constant dense<0.000000e+00> : vector<2x128xf32>
    %272 = tpu.matmul %268, %3, %cst_49 {dimension_numbers = #tpu.dot_dimension_numbers<[1], [0], [0], [1], [0, 0, 1, 1], [], []>} : vector<2x32xf32>, vector<32x128xf32>, vector<2x128xf32> -> vector<2x128xf32>
    %273 = vector.broadcast %4 : vector<1x128xf32> to vector<2x128xf32>
    %274 = arith.addf %272, %273 : vector<2x128xf32>
    %275 = arith.negf %274 : vector<2x128xf32>
    %276 = math.exp %275 : vector<2x128xf32>
    %cst_50 = arith.constant 1.000000e+00 : f32
    %277 = vector.broadcast %cst_50 : f32 to vector<2x128xf32>
    %278 = arith.addf %277, %276 : vector<2x128xf32>
    %279 = arith.divf %277, %278 : vector<2x128xf32>
    %280 = math.tanh %274 : vector<2x128xf32>
    %281 = vector.extract_strided_slice %279 {offsets = [0, 0], sizes = [2, 32], strides = [1, 1]} : vector<2x128xf32> to vector<2x32xf32>
    %282 = vector.extract_strided_slice %279 {offsets = [0, 32], sizes = [2, 32], strides = [1, 1]} : vector<2x128xf32> to vector<2x32xf32>
    %283 = vector.extract_strided_slice %280 {offsets = [0, 64], sizes = [2, 32], strides = [1, 1]} : vector<2x128xf32> to vector<2x32xf32>
    %284 = vector.extract_strided_slice %279 {offsets = [0, 96], sizes = [2, 32], strides = [1, 1]} : vector<2x128xf32> to vector<2x32xf32>
    %285 = arith.mulf %282, %266 : vector<2x32xf32>
    %286 = arith.mulf %281, %283 : vector<2x32xf32>
    %287 = arith.addf %285, %286 : vector<2x32xf32>
    %288 = math.tanh %287 : vector<2x32xf32>
    %289 = arith.mulf %284, %288 : vector<2x32xf32>
    %c0_51 = arith.constant 0 : index
    %c5 = arith.constant 5 : index
    %c0_52 = arith.constant 0 : index
    %290 = vector.load %arg3[%c0_51, %c5, %c0_52] : memref<2x8x32xf32, #tpu.memory_space<vmem>>, vector<2x1x32xf32>
    %291 = vector.shape_cast %290 : vector<2x1x32xf32> to vector<2x32xf32>
    %292 = vector.shape_cast %289 : vector<2x32xf32> to vector<2x1x32xf32>
    tpu.vector_store %arg3[%c0_51, %c5, %c0_52], %292 {strides = array<i32>} : memref<2x8x32xf32, #tpu.memory_space<vmem>>, vector<2x1x32xf32>,
    %cst_53 = arith.constant dense<0.000000e+00> : vector<2x128xf32>
    %293 = tpu.matmul %289, %3, %cst_53 {dimension_numbers = #tpu.dot_dimension_numbers<[1], [0], [0], [1], [0, 0, 1, 1], [], []>} : vector<2x32xf32>, vector<32x128xf32>, vector<2x128xf32> -> vector<2x128xf32>
    %294 = vector.broadcast %4 : vector<1x128xf32> to vector<2x128xf32>
    %295 = arith.addf %293, %294 : vector<2x128xf32>
    %296 = arith.negf %295 : vector<2x128xf32>
    %297 = math.exp %296 : vector<2x128xf32>
    %cst_54 = arith.constant 1.000000e+00 : f32
    %298 = vector.broadcast %cst_54 : f32 to vector<2x128xf32>
    %299 = arith.addf %298, %297 : vector<2x128xf32>
    %300 = arith.divf %298, %299 : vector<2x128xf32>
    %301 = math.tanh %295 : vector<2x128xf32>
    %302 = vector.extract_strided_slice %300 {offsets = [0, 0], sizes = [2, 32], strides = [1, 1]} : vector<2x128xf32> to vector<2x32xf32>
    %303 = vector.extract_strided_slice %300 {offsets = [0, 32], sizes = [2, 32], strides = [1, 1]} : vector<2x128xf32> to vector<2x32xf32>
    %304 = vector.extract_strided_slice %301 {offsets = [0, 64], sizes = [2, 32], strides = [1, 1]} : vector<2x128xf32> to vector<2x32xf32>
    %305 = vector.extract_strided_slice %300 {offsets = [0, 96], sizes = [2, 32], strides = [1, 1]} : vector<2x128xf32> to vector<2x32xf32>
    %306 = arith.mulf %303, %287 : vector<2x32xf32>
    %307 = arith.mulf %302, %304 : vector<2x32xf32>
    %308 = arith.addf %306, %307 : vector<2x32xf32>
    %309 = math.tanh %308 : vector<2x32xf32>
    %310 = arith.mulf %305, %309 : vector<2x32xf32>
    %c0_55 = arith.constant 0 : index
    %c6 = arith.constant 6 : index
    %c0_56 = arith.constant 0 : index
    %311 = vector.load %arg3[%c0_55, %c6, %c0_56] : memref<2x8x32xf32, #tpu.memory_space<vmem>>, vector<2x1x32xf32>
    %312 = vector.shape_cast %311 : vector<2x1x32xf32> to vector<2x32xf32>
    %313 = vector.shape_cast %310 : vector<2x32xf32> to vector<2x1x32xf32>
    tpu.vector_store %arg3[%c0_55, %c6, %c0_56], %313 {strides = array<i32>} : memref<2x8x32xf32, #tpu.memory_space<vmem>>, vector<2x1x32xf32>,
    %cst_57 = arith.constant dense<0.000000e+00> : vector<2x128xf32>
    %314 = tpu.matmul %310, %3, %cst_57 {dimension_numbers = #tpu.dot_dimension_numbers<[1], [0], [0], [1], [0, 0, 1, 1], [], []>} : vector<2x32xf32>, vector<32x128xf32>, vector<2x128xf32> -> vector<2x128xf32>
    %315 = vector.broadcast %4 : vector<1x128xf32> to vector<2x128xf32>
    %316 = arith.addf %314, %315 : vector<2x128xf32>
    %317 = arith.negf %316 : vector<2x128xf32>
    %318 = math.exp %317 : vector<2x128xf32>
    %cst_58 = arith.constant 1.000000e+00 : f32
    %319 = vector.broadcast %cst_58 : f32 to vector<2x128xf32>
    %320 = arith.addf %319, %318 : vector<2x128xf32>
    %321 = arith.divf %319, %320 : vector<2x128xf32>
    %322 = math.tanh %316 : vector<2x128xf32>
    %323 = vector.extract_strided_slice %321 {offsets = [0, 0], sizes = [2, 32], strides = [1, 1]} : vector<2x128xf32> to vector<2x32xf32>
    %324 = vector.extract_strided_slice %321 {offsets = [0, 32], sizes = [2, 32], strides = [1, 1]} : vector<2x128xf32> to vector<2x32xf32>
    %325 = vector.extract_strided_slice %322 {offsets = [0, 64], sizes = [2, 32], strides = [1, 1]} : vector<2x128xf32> to vector<2x32xf32>
    %326 = vector.extract_strided_slice %321 {offsets = [0, 96], sizes = [2, 32], strides = [1, 1]} : vector<2x128xf32> to vector<2x32xf32>
    %327 = arith.mulf %324, %308 : vector<2x32xf32>
    %328 = arith.mulf %323, %325 : vector<2x32xf32>
    %329 = arith.addf %327, %328 : vector<2x32xf32>
    %330 = math.tanh %329 : vector<2x32xf32>
    %331 = arith.mulf %326, %330 : vector<2x32xf32>
    %c0_59 = arith.constant 0 : index
    %c7 = arith.constant 7 : index
    %c0_60 = arith.constant 0 : index
    %332 = vector.load %arg3[%c0_59, %c7, %c0_60] : memref<2x8x32xf32, #tpu.memory_space<vmem>>, vector<2x1x32xf32>
    %333 = vector.shape_cast %332 : vector<2x1x32xf32> to vector<2x32xf32>
    %334 = vector.shape_cast %331 : vector<2x32xf32> to vector<2x1x32xf32>
    tpu.vector_store %arg3[%c0_59, %c7, %c0_60], %334 {strides = array<i32>} : memref<2x8x32xf32, #tpu.memory_space<vmem>>, vector<2x1x32xf32>,
    %c0_61 = arith.constant 0 : index
    %c0_62 = arith.constant 0 : index
    %c0_63 = arith.constant 0 : index
    %335 = vector.load %arg3[%c0_61, %c0_62, %c0_63] : memref<2x8x32xf32, #tpu.memory_space<vmem>>, vector<2x8x32xf32>
    %336 = vector.shape_cast %335 : vector<2x8x32xf32> to vector<16x32xf32>
    %cst_64 = arith.constant dense<0.000000e+00> : vector<16x128xf32>
    %337 = tpu.matmul %336, %5, %cst_64 {dimension_numbers = #tpu.dot_dimension_numbers<[1], [0], [0], [1], [0, 0, 1, 1], [], []>} : vector<16x32xf32>, vector<32x128xf32>, vector<16x128xf32> -> vector<16x128xf32>
    %338 = vector.broadcast %6 : vector<1x128xf32> to vector<16x128xf32>
    %339 = arith.addf %337, %338 : vector<16x128xf32>
    %340 = vector.extract_strided_slice %339 {offsets = [0, 0], sizes = [16, 4], strides = [1, 1]} : vector<16x128xf32> to vector<16x4xf32>
    %341 = vector.shape_cast %340 : vector<16x4xf32> to vector<2x8x4xf32>
    %c0_65 = arith.constant 0 : index
    %c0_66 = arith.constant 0 : index
    %c0_67 = arith.constant 0 : index
    %342 = vector.load %arg2[%c0_65, %c0_66, %c0_67] : memref<2x8x4xf32, #tpu.memory_space<vmem>>, vector<2x8x4xf32>
    tpu.vector_store %arg2[%c0_65, %c0_66, %c0_67], %341 {strides = array<i32>} : memref<2x8x4xf32, #tpu.memory_space<vmem>>, vector<2x8x4xf32>,
    return
  }
}

</mosaic_0001>

<bundles_post_ra>
// kernel: recurrent_ae_forward.1
= control target key start
LH: loop header
LB: loop body
LE: loop exit
PB: predicated region body
PF: predicated region fallthrough
CT: control target
= control target key end

     0   :  { %7 = vsyncpa [#allocation4], 0  ;;  %s2995_s9 = smov [#allocation3]   ;;  %s3466_s0 = inlined_call_operand.vmem [shape: f32[2,8,4], index: 0, kind: input, shape index: {}]   ;;  %s3467_s1 = inlined_call_operand.hbm [shape: f32[128,128], index: 1, kind: input, shape index: {}]   ;;  %s3468_s2 = inlined_call_operand.vmem [shape: f32[2,8,4], index: 2, kind: output, shape index: {}]  }
   0x1   :  { %s15_s10 = sshll.u32 %s2995_s9, 4  ;;  %s16_s10 = int_to_ptr.vmem [resolvable:$true] %s15_s10 }
   0x2   :  { %s2981_s11 = scalar_lea.vmem %s16_s10, 2048  ;;  %p2986_p1 = scmp.lt.s32.totalorder %s16_s10, %s16_s10 }
   0x3   :  { %p2982_p0 = scmp.ne.s32.totalorder %s16_s10, %s2981_s11  ;;  %p2987_p2 = scmp.lt.s32.totalorder %s2981_s11, %s2981_s11 }
   0x5   :  { %p2988_p3 = por %p2987_p2, %p2986_p1 }
   0x7   :  { %p2989_p4 = pnand %p2988_p3, %p2982_p0 }
   0x9   :  { %2992 = shalt.err (!%p2989_p4)
}
   0xa   :  { %s2996_s12 = smov 128   ;;  %s2997_s13 = smov 8  }
   0xb   :  { %21 = dma.hbm_to_vmem [thread:$0]  %s3467_s1, 2048, %s16_s10, [#allocation4], %s2996_s12, %s2996_s12, %s2997_s13  }
   0xc   :  { %2993 = dma.done.wait [#allocation4], 2048  }
   0xd   :  { %2994 = vsyncadd [#allocation4], 4294965248  ;;  %v2998_v0 = vmov 0.0   ;;  %vm2999_vm0 = vmmov 0   ;;  %vm54_vm1 = vcmask 1043456   ;;  %v3024_v1 = vld [vmem:[#allocation3 + $0x20] sm:$0xff] }
   0xe   :  { %2586 = vmatprep.subr.mxu1 %v2998_v0  ;;  %2594 = vmatprep.mubr.msk.f32.mxu1 %vm2999_vm0, %v2998_v0  ;;  %v25_v2 = vld [vmem:[#allocation3] sm:$0xf]  ;;  %v41_v3 = vld [vmem:[%s3466_s0] sm:$0xff]  ;;  %vm47_vm2 = vcmask 31744   ;;  %v3030_v4 = vld [vmem:[#allocation3 + $0x18] sm:$0xff]  ;;  %s3001_s19 = smov 32  }
   0xf   :  { %2587 = vmatpush3.msra.mxu1 %v3024_v1  ;;  %2581 = vmatprep.subr.msk.mxu0 %vm54_vm1, %v25_v2  ;;  %v42_v5 = vld [vmem:[%s3466_s0 + $0x8] sm:$0xff]  ;;  %v3036_v6 = vld [vmem:[#allocation3 + $0x10] sm:$0xff]  ;;  %v3042_v7 = vld [vmem:[#allocation3 + $0x8] sm:$0xff]  ;;  %s3000_s0 = smov 64   ;;  %vm264_vm3 = vcmask 1041409   ;;  %vm133_vm4 = vcmask 261120  }
  0x10   :  { %2588 = vmatprep.subr.mxu1 %v2998_v0  ;;  %2582 = vmatpush3.msk.msra.mxu0 %vm54_vm1, %v25_v2  ;;  %v2445_v9 = vld [vmem:[#allocation3 + $0x28] ss:$0 sm:$0xff]  ;;  %vm1389_vm5 = vcmask 253952  }
  0x11   :  { %2583 = vmatprep.mubr.msk.f32.mxu0 %vm47_vm2, %v41_v3  ;;  %2589 = vmatpush3.msra.mxu1 %v3030_v4 }
  0x12   :  { %2584 = vmatmul.mubr.msk.f32.vlgmr.msra.gmra.mxu0 %vm47_vm2, %v42_v5  ;;  %2590 = vmatprep.subr.mxu1 %v2998_v0 }
  0x13   :  { %2591 = vmatpush3.msra.mxu1 %v3036_v6  ;;  %2597 = vmatprep.subr.mxu0 %v2998_v0 }
  0x14   :  { %2592 = vmatprep.subr.mxu1 %v2998_v0  ;;  %2598 = vmatpush3.msra.mxu0 %v3024_v1 }
  0x15   :  { %2593 = vmatpush3.msra.mxu1 %v3042_v7  ;;  %2599 = vmatprep.subr.mxu0 %v2998_v0 }
  0x16   :  { %2595 = vmatmul.mubr.f32.vlgmr.msra.gmra.mxu1 %v2998_v0  ;;  %2600 = vmatpush3.msra.mxu0 %v3030_v4 }
  0x17   :  { %2601 = vmatprep.subr.mxu0 %v2998_v0  ;;  %2605 = vmatprep.mubr.msk.f32.mxu0 %vm2999_vm0, %v2998_v0 }
  0x18   :  { %2602 = vmatpush3.msra.mxu0 %v3036_v6  ;;  %2608 = vmatprep.subr.mxu1 %v2998_v0 }
  0x19   :  { %2603 = vmatprep.subr.mxu0 %v2998_v0  ;;  %2609 = vmatpush3.msra.mxu1 %v3024_v1 }
  0x1a   :  { %2604 = vmatpush3.msra.mxu0 %v3042_v7  ;;  %2610 = vmatprep.subr.mxu1 %v2998_v0 }
  0x1b   :  { %2611 = vmatpush3.msra.mxu1 %v3030_v4  ;;  %2616 = vmatprep.mubr.msk.f32.mxu1 %vm2999_vm0, %v2998_v0 }
  0x1c   :  { %2612 = vmatprep.subr.mxu1 %v2998_v0  ;;  %2619 = vmatprep.subr.mxu0 %v2998_v0 }
  0x1d   :  { %2613 = vmatpush3.msra.mxu1 %v3036_v6 }
  0x1e   :  { %2614 = vmatprep.subr.mxu1 %v2998_v0 }
  0x1f   :  { %2615 = vmatpush3.msra.mxu1 %v3042_v7 }
  0x20   :  { %2630 = vmatprep.subr.mxu1 %v2998_v0 }
  0xd2   :  { %v2585_v8 = vpop.f32.mrf.mxu0 }
  0xd3   :  { %v3070_v10 = vadd.f32 %v2585_v8, %v2445_v9 }
  0xd4   :  { %v124_v11 = vpop.f32.mrf.mxu0 }
  0xd5   :  { %v3072_v14 = vadd.f32 %v2445_v9, %v124_v11 }
  0xd6   :  { %v203_v12 = vpop.f32.mrf.mxu1 }
  0xd7   :  { %v208_v13 = vrot.slane %v203_v12, 1  ;;  %v211_v17 = vadd.f32 %v203_v12, %v3072_v14 }
  0xd8   :  { %v2596_v15 = vpop.f32.mrf.mxu1 }
  0xd9   :  { %v212_v16 = vadd.f32 %v208_v13, %v3070_v10  ;;  %v2449_v21 = vmul.f32 -1.442695, %v211_v17 }
  0xdb   :  { %2781 = vtanh.f32 %v212_v16  ;;  %v2450_v20 = vmul.f32 -1.442695, %v212_v16 }
  0xdc   :  { %2783 = vtanh.f32 %v211_v17 }
  0xdd   :  { %2785 = vpow2.f32 %v2450_v20 }
  0xde   :  { %2787 = vpow2.f32 %v2449_v21 }
  0xe8   :  { %v2782_v18 = vpop.eup %2781 }
  0xe9   :  { %233 = vrot.lane.b32.xlu0 %v2782_v18, %s3000_s0  ;;  %v2784_v19 = vpop.eup %2783 }
  0xea   :  { %v2786_v22 = vpop.eup %2785 }
  0xeb   :  { %v220_v23 = vadd.f32 1.0, %v2786_v22  ;;  %v2788_v24 = vpop.eup %2787 }
  0xec   :  { %v219_v25 = vadd.f32 1.0, %v2788_v24 }
  0xed   :  { %231 = vrot.lane.b32.xlu0 %v2784_v19, %s3000_s0  ;;  %2789 = vrcp.f32 %v220_v23 }
  0xee   :  { %2791 = vrcp.f32 %v219_v25 }
  0xfa   :  { %v2790_v26 = vpop.eup %2789 }
  0xfb   :  { %v2792_v29 = vpop.eup %2791  ;;  %v228_v32 = vmul.f32 0.0, %v2790_v26 }
  0xfc   :  { %v227_v35 = vmul.f32 0.0, %v2792_v29 }
 0x15b   :  { %v234_v27 = vpop.permute.xlu0 %233 }
 0x15c   :  { %v238_v28 = vmul.f32 %v2790_v26, %v234_v27 }
 0x15e   :  { %243 = vrot.lane.b32.xlu1 %v238_v28, %s3001_s19 }
 0x15f   :  { %v232_v30 = vpop.permute.xlu0 %231 }
 0x160   :  { %v237_v31 = vmul.f32 %v2792_v29, %v232_v30 }
 0x162   :  { %241 = vrot.lane.b32.xlu1 %v237_v31, %s3001_s19 }
 0x1d0   :  { %v244_v33 = vpop.permute.xlu1 %243 }
 0x1d1   :  { %v248_v34 = vadd.f32 %v244_v33, %v228_v32 }
 0x1d3   :  { %2793 = vtanh.f32 %v248_v34  ;;  %v363_v5 = vrot.slane %v248_v34, 7 }
 0x1d4   :  { %v242_v36 = vpop.permute.xlu1 %241 }
 0x1d5   :  { %v247_v37 = vadd.f32 %v242_v36, %v227_v35 }
 0x1d7   :  { %2795 = vtanh.f32 %v247_v37  ;;  %v362_v9 = vrot.slane %v247_v37, 7 }
 0x1e0   :  { %v2794_v38 = vpop.eup %2793 }
 0x1e1   :  { %255 = vrot.lane.b32.xlu0 %v2794_v38, %s3000_s0 }
 0x1e4   :  { %v2796_v39 = vpop.eup %2795 }
 0x1e5   :  { %253 = vrot.lane.b32.xlu1 %v2796_v39, %s3000_s0 }
 0x253   :  { %v256_v40 = vpop.permute.xlu0 %255 }
 0x254   :  { %v260_v41 = vmul.f32 %v2790_v26, %v256_v40 }
 0x256   :  { %v263_v43 = vrot.slane %v260_v41, 7 }
 0x257   :  { %v254_v42 = vpop.permute.xlu1 %253 }
 0x258   :  { %v259_v44 = vmul.f32 %v2792_v29, %v254_v42 }
 0x25a   :  { %v265_v45 = vsel %vm264_vm3, %v263_v43, %v259_v44 }
 0x25b   :  { %266 = vrot.lane.b32.xlu0 %v265_v45, %s3001_s19 }
 0x2cd   :  { %v267_v46 = vpop.permute.xlu0 %266 }
 0x2ce   :  { %2606 = vmatmul.mubr.msk.f32.vlgmr.msra.gmra.mxu0 %vm133_vm4, %v267_v46 }
 0x2cf   :  { %2620 = vmatpush3.msra.mxu0 %v3024_v1  ;;  %2627 = vmatprep.mubr.msk.f32.mxu0 %vm2999_vm0, %v2998_v0 }
 0x2d0   :  { %2621 = vmatprep.subr.mxu0 %v2998_v0 }
 0x2d1   :  { %2622 = vmatpush3.msra.mxu0 %v3030_v4 }
 0x2d2   :  { %2623 = vmatprep.subr.mxu0 %v2998_v0 }
 0x2d3   :  { %2624 = vmatpush3.msra.mxu0 %v3036_v6 }
 0x2d4   :  { %2625 = vmatprep.subr.mxu0 %v2998_v0 }
 0x2d5   :  { %2626 = vmatpush3.msra.mxu0 %v3042_v7 }
 0x2d6   :  { %2641 = vmatprep.subr.mxu0 %v2998_v0 }
 0x38e   :  { %v336_v47 = vpop.f32.mrf.mxu0 }
 0x38f   :  { %v341_v48 = vrot.slane %v336_v47, 7  ;;  %v345_v49 = vadd.f32 %v336_v47, %v3070_v10 }
 0x390   :  { %v2607_v50 = vpop.f32.mrf.mxu0 }
 0x391   :  { %v344_v51 = vadd.f32 %v341_v48, %v3072_v14  ;;  %2797 = vtanh.f32 %v345_v49  ;;  %v2453_v54 = vmul.f32 -1.442695, %v345_v49 }
 0x393   :  { %2799 = vtanh.f32 %v344_v51  ;;  %v2452_v55 = vmul.f32 -1.442695, %v344_v51 }
 0x394   :  { %2801 = vpow2.f32 %v2453_v54 }
 0x395   :  { %2803 = vpow2.f32 %v2452_v55 }
 0x39e   :  { %v2798_v52 = vpop.eup %2797 }
 0x39f   :  { %372 = vrot.lane.b32.xlu0 %v2798_v52, %s3000_s0 }
 0x3a0   :  { %v2800_v53 = vpop.eup %2799 }
 0x3a1   :  { %370 = vrot.lane.b32.xlu1 %v2800_v53, %s3000_s0  ;;  %v2802_v56 = vpop.eup %2801 }
 0x3a2   :  { %v2804_v57 = vpop.eup %2803  ;;  %v353_v58 = vadd.f32 1.0, %v2802_v56 }
 0x3a3   :  { %v352_v59 = vadd.f32 1.0, %v2804_v57 }
 0x3a4   :  { %2805 = vrcp.f32 %v353_v58 }
 0x3a5   :  { %2807 = vrcp.f32 %v352_v59 }
 0x3b1   :  { %v2806_v60 = vpop.eup %2805 }
 0x3b2   :  { %v2808_v63 = vpop.eup %2807  ;;  %v367_v8 = vmul.f32 %v2806_v60, %v363_v5 }
 0x3b3   :  { %v366_v13 = vmul.f32 %v2808_v63, %v362_v9 }
 0x411   :  { %v373_v61 = vpop.permute.xlu0 %372 }
 0x412   :  { %v377_v62 = vmul.f32 %v2806_v60, %v373_v61 }
 0x413   :  { %v371_v2 = vpop.permute.xlu1 %370 }
 0x414   :  { %382 = vrot.lane.b32.xlu0 %v377_v62, %s3001_s19  ;;  %v376_v3 = vmul.f32 %v2808_v63, %v371_v2 }
 0x416   :  { %380 = vrot.lane.b32.xlu1 %v376_v3, %s3001_s19 }
 0x486   :  { %v383_v11 = vpop.permute.xlu0 %382 }
 0x487   :  { %v387_v12 = vadd.f32 %v383_v11, %v367_v8 }
 0x488   :  { %v381_v15 = vpop.permute.xlu1 %380 }
 0x489   :  { %2809 = vtanh.f32 %v387_v12  ;;  %v386_v16 = vadd.f32 %v381_v15, %v366_v13  ;;  %v502_v47 = vrot.slane %v387_v12, 7 }
 0x48b   :  { %2811 = vtanh.f32 %v386_v16  ;;  %v501_v46 = vrot.slane %v386_v16, 7 }
 0x496   :  { %v2810_v17 = vpop.eup %2809 }
 0x497   :  { %394 = vrot.lane.b32.xlu0 %v2810_v17, %s3000_s0 }
 0x498   :  { %v2812_v18 = vpop.eup %2811 }
 0x499   :  { %392 = vrot.lane.b32.xlu1 %v2812_v18, %s3000_s0 }
 0x509   :  { %v395_v19 = vpop.permute.xlu0 %394 }
 0x50a   :  { %v399_v22 = vmul.f32 %v2806_v60, %v395_v19 }
 0x50b   :  { %v393_v20 = vpop.permute.xlu1 %392 }
 0x50c   :  { %v398_v21 = vmul.f32 %v2808_v63, %v393_v20 }
 0x50e   :  { %v402_v23 = vrot.slane %v398_v21, 1 }
 0x510   :  { %v403_v24 = vsel %vm264_vm3, %v399_v22, %v402_v23 }
 0x511   :  { %404 = vrot.lane.b32.xlu1 %v403_v24, %s3001_s19 }
 0x583   :  { %v405_v25 = vpop.permute.xlu1 %404 }
 0x584   :  { %2617 = vmatmul.mubr.msk.f32.vlgmr.msra.gmra.mxu1 %vm133_vm4, %v405_v25 }
 0x585   :  { %2631 = vmatpush3.msra.mxu1 %v3024_v1  ;;  %2638 = vmatprep.mubr.msk.f32.mxu1 %vm2999_vm0, %v2998_v0 }
 0x586   :  { %2632 = vmatprep.subr.mxu1 %v2998_v0 }
 0x587   :  { %2633 = vmatpush3.msra.mxu1 %v3030_v4 }
 0x588   :  { %2634 = vmatprep.subr.mxu1 %v2998_v0 }
 0x589   :  { %2635 = vmatpush3.msra.mxu1 %v3036_v6 }
 0x58a   :  { %2636 = vmatprep.subr.mxu1 %v2998_v0 }
 0x58b   :  { %2637 = vmatpush3.msra.mxu1 %v3042_v7 }
 0x58c   :  { %2652 = vmatprep.subr.mxu1 %v2998_v0 }
 0x644   :  { %v474_v26 = vpop.f32.mrf.mxu1 }
 0x645   :  { %v479_v27 = vrot.slane %v474_v26, 6  ;;  %v480_v28 = vrot.slane %v474_v26, 7 }
 0x646   :  { %v2618_v29 = vpop.f32.mrf.mxu1 }
 0x647   :  { %v483_v30 = vadd.f32 %v479_v27, %v3072_v14  ;;  %v484_v31 = vadd.f32 %v480_v28, %v3070_v10 }
 0x649   :  { %2813 = vtanh.f32 %v483_v30  ;;  %v2455_v34 = vmul.f32 -1.442695, %v483_v30  ;;  %v2456_v35 = vmul.f32 -1.442695, %v484_v31 }
 0x64a   :  { %2815 = vtanh.f32 %v484_v31 }
 0x64b   :  { %2817 = vpow2.f32 %v2455_v34 }
 0x64c   :  { %2819 = vpow2.f32 %v2456_v35 }
 0x656   :  { %v2814_v32 = vpop.eup %2813 }
 0x657   :  { %v2816_v33 = vpop.eup %2815  ;;  %509 = vrot.lane.b32.xlu0 %v2814_v32, %s3000_s0 }
 0x658   :  { %511 = vrot.lane.b32.xlu1 %v2816_v33, %s3000_s0  ;;  %v2818_v36 = vpop.eup %2817 }
 0x659   :  { %v2820_v37 = vpop.eup %2819  ;;  %v491_v38 = vadd.f32 1.0, %v2818_v36 }
 0x65a   :  { %v492_v39 = vadd.f32 1.0, %v2820_v37 }
 0x65b   :  { %2821 = vrcp.f32 %v491_v38 }
 0x65c   :  { %2823 = vrcp.f32 %v492_v39 }
 0x668   :  { %v2822_v40 = vpop.eup %2821 }
 0x669   :  { %v2824_v42 = vpop.eup %2823  ;;  %v505_v48 = vmul.f32 %v2822_v40, %v501_v46 }
 0x66a   :  { %v506_v49 = vmul.f32 %v2824_v42, %v502_v47 }
 0x6c9   :  { %v510_v41 = vpop.permute.xlu0 %509 }
 0x6ca   :  { %v512_v43 = vpop.permute.xlu1 %511  ;;  %v515_v44 = vmul.f32 %v2822_v40, %v510_v41 }
 0x6cb   :  { %v516_v45 = vmul.f32 %v2824_v42, %v512_v43 }
 0x6cc   :  { %519 = vrot.lane.b32.xlu0 %v515_v44, %s3001_s19 }
 0x6cd   :  { %521 = vrot.lane.b32.xlu1 %v516_v45, %s3001_s19 }
 0x73e   :  { %v520_v50 = vpop.permute.xlu0 %519 }
 0x73f   :  { %v522_v51 = vpop.permute.xlu1 %521  ;;  %v525_v52 = vadd.f32 %v520_v50, %v505_v48 }
 0x740   :  { %v526_v53 = vadd.f32 %v522_v51, %v506_v49 }
 0x741   :  { %2825 = vtanh.f32 %v525_v52  ;;  %v641_v27 = vrot.slane %v525_v52, 7 }
 0x742   :  { %2827 = vtanh.f32 %v526_v53  ;;  %v642_v28 = vrot.slane %v526_v53, 7 }
 0x74e   :  { %v2826_v54 = vpop.eup %2825 }
 0x74f   :  { %v2828_v55 = vpop.eup %2827  ;;  %531 = vrot.lane.b32.xlu0 %v2826_v54, %s3000_s0 }
 0x750   :  { %533 = vrot.lane.b32.xlu1 %v2828_v55, %s3000_s0 }
 0x7c1   :  { %v532_v56 = vpop.permute.xlu0 %531 }
 0x7c2   :  { %v534_v57 = vpop.permute.xlu1 %533  ;;  %v537_v58 = vmul.f32 %v2822_v40, %v532_v56 }
 0x7c3   :  { %v538_v59 = vmul.f32 %v2824_v42, %v534_v57 }
 0x7c4   :  { %v541_v60 = vrot.slane %v537_v58, 2 }
 0x7c5   :  { %v542_v61 = vrot.slane %v538_v59, 1 }
 0x7c7   :  { %v543_v62 = vsel %vm264_vm3, %v542_v61, %v541_v60 }
 0x7c8   :  { %544 = vrot.lane.b32.xlu0 %v543_v62, %s3001_s19 }
 0x83a   :  { %v545_v63 = vpop.permute.xlu0 %544 }
 0x83b   :  { %2628 = vmatmul.mubr.msk.f32.vlgmr.msra.gmra.mxu0 %vm133_vm4, %v545_v63 }
 0x83c   :  { %2642 = vmatpush3.msra.mxu0 %v3024_v1  ;;  %2649 = vmatprep.mubr.msk.f32.mxu0 %vm2999_vm0, %v2998_v0 }
 0x83d   :  { %2643 = vmatprep.subr.mxu0 %v2998_v0 }
 0x83e   :  { %2644 = vmatpush3.msra.mxu0 %v3030_v4 }
 0x83f   :  { %2645 = vmatprep.subr.mxu0 %v2998_v0 }
 0x840   :  { %2646 = vmatpush3.msra.mxu0 %v3036_v6 }
 0x841   :  { %2647 = vmatprep.subr.mxu0 %v2998_v0 }
 0x842   :  { %2648 = vmatpush3.msra.mxu0 %v3042_v7 }
 0x843   :  { %2663 = vmatprep.subr.mxu0 %v2998_v0 }
 0x8fb   :  { %v614_v2 = vpop.f32.mrf.mxu0 }
 0x8fc   :  { %v619_v3 = vrot.slane %v614_v2, 5  ;;  %v620_v5 = vrot.slane %v614_v2, 6 }
 0x8fd   :  { %v2629_v8 = vpop.f32.mrf.mxu0 }
 0x8fe   :  { %v623_v9 = vadd.f32 %v619_v3, %v3072_v14  ;;  %v624_v11 = vadd.f32 %v620_v5, %v3070_v10 }
 0x900   :  { %2829 = vtanh.f32 %v623_v9  ;;  %v2458_v15 = vmul.f32 -1.442695, %v623_v9  ;;  %v2459_v16 = vmul.f32 -1.442695, %v624_v11 }
 0x901   :  { %2831 = vtanh.f32 %v624_v11 }
 0x902   :  { %2833 = vpow2.f32 %v2458_v15 }
 0x903   :  { %2835 = vpow2.f32 %v2459_v16 }
 0x90d   :  { %v2830_v12 = vpop.eup %2829 }
 0x90e   :  { %v2832_v13 = vpop.eup %2831  ;;  %649 = vrot.lane.b32.xlu1 %v2830_v12, %s3000_s0 }
 0x90f   :  { %651 = vrot.lane.b32.xlu0 %v2832_v13, %s3000_s0  ;;  %v2834_v17 = vpop.eup %2833 }
 0x910   :  { %v2836_v18 = vpop.eup %2835  ;;  %v631_v19 = vadd.f32 1.0, %v2834_v17 }
 0x911   :  { %v632_v20 = vadd.f32 1.0, %v2836_v18 }
 0x912   :  { %2837 = vrcp.f32 %v631_v19 }
 0x913   :  { %2839 = vrcp.f32 %v632_v20 }
 0x91f   :  { %v2838_v21 = vpop.eup %2837 }
 0x920   :  { %v2840_v23 = vpop.eup %2839  ;;  %v645_v29 = vmul.f32 %v2838_v21, %v641_v27 }
 0x921   :  { %v646_v30 = vmul.f32 %v2840_v23, %v642_v28 }
 0x980   :  { %v650_v22 = vpop.permute.xlu1 %649 }
 0x981   :  { %v652_v24 = vpop.permute.xlu0 %651  ;;  %v655_v25 = vmul.f32 %v2838_v21, %v650_v22 }
 0x982   :  { %v656_v26 = vmul.f32 %v2840_v23, %v652_v24 }
 0x983   :  { %659 = vrot.lane.b32.xlu1 %v655_v25, %s3001_s19 }
 0x984   :  { %661 = vrot.lane.b32.xlu0 %v656_v26, %s3001_s19 }
 0x9f5   :  { %v660_v31 = vpop.permute.xlu1 %659 }
 0x9f6   :  { %v662_v32 = vpop.permute.xlu0 %661  ;;  %v665_v33 = vadd.f32 %v660_v31, %v645_v29 }
 0x9f7   :  { %v666_v34 = vadd.f32 %v662_v32, %v646_v30 }
 0x9f8   :  { %2841 = vtanh.f32 %v665_v33  ;;  %v781_v3 = vrot.slane %v665_v33, 7 }
 0x9f9   :  { %2843 = vtanh.f32 %v666_v34  ;;  %v782_v5 = vrot.slane %v666_v34, 7 }
 0xa05   :  { %v2842_v35 = vpop.eup %2841 }
 0xa06   :  { %v2844_v36 = vpop.eup %2843  ;;  %671 = vrot.lane.b32.xlu1 %v2842_v35, %s3000_s0 }
 0xa07   :  { %673 = vrot.lane.b32.xlu0 %v2844_v36, %s3000_s0 }
 0xa78   :  { %v672_v37 = vpop.permute.xlu1 %671 }
 0xa79   :  { %v674_v38 = vpop.permute.xlu0 %673  ;;  %v677_v39 = vmul.f32 %v2838_v21, %v672_v37 }
 0xa7a   :  { %v678_v40 = vmul.f32 %v2840_v23, %v674_v38 }
 0xa7b   :  { %v681_v41 = vrot.slane %v677_v39, 3 }
 0xa7c   :  { %v682_v42 = vrot.slane %v678_v40, 2 }
 0xa7e   :  { %v683_v43 = vsel %vm264_vm3, %v682_v42, %v681_v41 }
 0xa7f   :  { %684 = vrot.lane.b32.xlu1 %v683_v43, %s3001_s19 }
 0xaf1   :  { %v685_v44 = vpop.permute.xlu1 %684 }
 0xaf2   :  { %2639 = vmatmul.mubr.msk.f32.vlgmr.msra.gmra.mxu1 %vm133_vm4, %v685_v44 }
 0xaf3   :  { %2653 = vmatpush3.msra.mxu1 %v3024_v1  ;;  %2660 = vmatprep.mubr.msk.f32.mxu1 %vm2999_vm0, %v2998_v0 }
 0xaf4   :  { %2654 = vmatprep.subr.mxu1 %v2998_v0 }
 0xaf5   :  { %2655 = vmatpush3.msra.mxu1 %v3030_v4 }
 0xaf6   :  { %2656 = vmatprep.subr.mxu1 %v2998_v0 }
 0xaf7   :  { %2657 = vmatpush3.msra.mxu1 %v3036_v6 }
 0xaf8   :  { %2658 = vmatprep.subr.mxu1 %v2998_v0 }
 0xaf9   :  { %2659 = vmatpush3.msra.mxu1 %v3042_v7 }
 0xafa   :  { %2674 = vmatprep.subr.mxu1 %v2998_v0 }
 0xbb2   :  { %v754_v45 = vpop.f32.mrf.mxu1 }
 0xbb3   :  { %v759_v46 = vrot.slane %v754_v45, 4  ;;  %v760_v47 = vrot.slane %v754_v45, 5 }
 0xbb4   :  { %v2640_v48 = vpop.f32.mrf.mxu1 }
 0xbb5   :  { %v763_v49 = vadd.f32 %v759_v46, %v3072_v14  ;;  %v764_v50 = vadd.f32 %v760_v47, %v3070_v10 }
 0xbb7   :  { %2845 = vtanh.f32 %v763_v49  ;;  %v2461_v53 = vmul.f32 -1.442695, %v763_v49  ;;  %v2462_v54 = vmul.f32 -1.442695, %v764_v50 }
 0xbb8   :  { %2847 = vtanh.f32 %v764_v50 }
 0xbb9   :  { %2849 = vpow2.f32 %v2461_v53 }
 0xbba   :  { %2851 = vpow2.f32 %v2462_v54 }
 0xbc4   :  { %v2846_v51 = vpop.eup %2845 }
 0xbc5   :  { %v2848_v52 = vpop.eup %2847  ;;  %789 = vrot.lane.b32.xlu0 %v2846_v51, %s3000_s0 }
 0xbc6   :  { %791 = vrot.lane.b32.xlu1 %v2848_v52, %s3000_s0  ;;  %v2850_v55 = vpop.eup %2849 }
 0xbc7   :  { %v2852_v56 = vpop.eup %2851  ;;  %v771_v57 = vadd.f32 1.0, %v2850_v55 }
 0xbc8   :  { %v772_v58 = vadd.f32 1.0, %v2852_v56 }
 0xbc9   :  { %2853 = vrcp.f32 %v771_v57 }
 0xbca   :  { %2855 = vrcp.f32 %v772_v58 }
 0xbd6   :  { %v2854_v59 = vpop.eup %2853 }
 0xbd7   :  { %v2856_v61 = vpop.eup %2855  ;;  %v785_v8 = vmul.f32 %v2854_v59, %v781_v3 }
 0xbd8   :  { %v786_v9 = vmul.f32 %v2856_v61, %v782_v5 }
 0xc37   :  { %v790_v60 = vpop.permute.xlu0 %789 }
 0xc38   :  { %v792_v62 = vpop.permute.xlu1 %791  ;;  %v795_v63 = vmul.f32 %v2854_v59, %v790_v60 }
 0xc39   :  { %v796_v2 = vmul.f32 %v2856_v61, %v792_v62 }
 0xc3a   :  { %799 = vrot.lane.b32.xlu0 %v795_v63, %s3001_s19 }
 0xc3b   :  { %801 = vrot.lane.b32.xlu1 %v796_v2, %s3001_s19 }
 0xcac   :  { %v800_v11 = vpop.permute.xlu0 %799 }
 0xcad   :  { %v802_v12 = vpop.permute.xlu1 %801  ;;  %v805_v13 = vadd.f32 %v800_v11, %v785_v8 }
 0xcae   :  { %v806_v15 = vadd.f32 %v802_v12, %v786_v9 }
 0xcaf   :  { %2857 = vtanh.f32 %v805_v13  ;;  %v921_v42 = vrot.slane %v805_v13, 7 }
 0xcb0   :  { %2859 = vtanh.f32 %v806_v15  ;;  %v922_v43 = vrot.slane %v806_v15, 7 }
 0xcbc   :  { %v2858_v16 = vpop.eup %2857 }
 0xcbd   :  { %v2860_v17 = vpop.eup %2859  ;;  %811 = vrot.lane.b32.xlu0 %v2858_v16, %s3000_s0 }
 0xcbe   :  { %813 = vrot.lane.b32.xlu1 %v2860_v17, %s3000_s0 }
 0xd2f   :  { %v812_v18 = vpop.permute.xlu0 %811 }
 0xd30   :  { %v814_v19 = vpop.permute.xlu1 %813  ;;  %v817_v20 = vmul.f32 %v2854_v59, %v812_v18 }
 0xd31   :  { %v818_v21 = vmul.f32 %v2856_v61, %v814_v19 }
 0xd32   :  { %v821_v22 = vrot.slane %v817_v20, 4 }
 0xd33   :  { %v822_v23 = vrot.slane %v818_v21, 3 }
 0xd35   :  { %v823_v24 = vsel %vm264_vm3, %v822_v23, %v821_v22 }
 0xd36   :  { %824 = vrot.lane.b32.xlu0 %v823_v24, %s3001_s19 }
 0xda8   :  { %v825_v25 = vpop.permute.xlu0 %824 }
 0xda9   :  { %2650 = vmatmul.mubr.msk.f32.vlgmr.msra.gmra.mxu0 %vm133_vm4, %v825_v25 }
 0xdaa   :  { %2664 = vmatpush3.msra.mxu0 %v3024_v1  ;;  %2671 = vmatprep.mubr.msk.f32.mxu0 %vm2999_vm0, %v2998_v0 }
 0xdab   :  { %2665 = vmatprep.subr.mxu0 %v2998_v0 }
 0xdac   :  { %2666 = vmatpush3.msra.mxu0 %v3030_v4 }
 0xdad   :  { %2667 = vmatprep.subr.mxu0 %v2998_v0 }
 0xdae   :  { %2668 = vmatpush3.msra.mxu0 %v3036_v6 }
 0xdaf   :  { %2669 = vmatprep.subr.mxu0 %v2998_v0 }
 0xdb0   :  { %2670 = vmatpush3.msra.mxu0 %v3042_v7 }
 0xdb1   :  { %2685 = vmatprep.subr.mxu0 %v2998_v0 }
 0xe69   :  { %v894_v26 = vpop.f32.mrf.mxu0 }
 0xe6a   :  { %v899_v27 = vrot.slane %v894_v26, 3  ;;  %v900_v1 = vrot.slane %v894_v26, 4 }
 0xe6b   :  { %v2651_v28 = vpop.f32.mrf.mxu0 }
 0xe6c   :  { %v903_v29 = vadd.f32 %v899_v27, %v3072_v14  ;;  %v904_v30 = vadd.f32 %v900_v1, %v3070_v10 }
 0xe6e   :  { %2861 = vtanh.f32 %v903_v29  ;;  %v2464_v6 = vmul.f32 -1.442695, %v903_v29  ;;  %v2465_v7 = vmul.f32 -1.442695, %v904_v30 }
 0xe6f   :  { %2863 = vtanh.f32 %v904_v30 }
 0xe70   :  { %2865 = vpow2.f32 %v2464_v6 }
 0xe71   :  { %2867 = vpow2.f32 %v2465_v7 }
 0xe7b   :  { %v2862_v4 = vpop.eup %2861 }
 0xe7c   :  { %v2864_v31 = vpop.eup %2863  ;;  %929 = vrot.lane.b32.xlu1 %v2862_v4, %s3000_s0 }
 0xe7d   :  { %931 = vrot.lane.b32.xlu0 %v2864_v31, %s3000_s0  ;;  %v2866_v32 = vpop.eup %2865 }
 0xe7e   :  { %v2868_v33 = vpop.eup %2867  ;;  %v911_v34 = vadd.f32 1.0, %v2866_v32 }
 0xe7f   :  { %v912_v35 = vadd.f32 1.0, %v2868_v33 }
 0xe80   :  { %2869 = vrcp.f32 %v911_v34 }
 0xe81   :  { %2871 = vrcp.f32 %v912_v35 }
 0xe8d   :  { %v2870_v36 = vpop.eup %2869 }
 0xe8e   :  { %v2872_v38 = vpop.eup %2871  ;;  %v925_v44 = vmul.f32 %v2870_v36, %v921_v42 }
 0xe8f   :  { %v926_v45 = vmul.f32 %v2872_v38, %v922_v43 }
 0xeee   :  { %v930_v37 = vpop.permute.xlu1 %929 }
 0xeef   :  { %v932_v39 = vpop.permute.xlu0 %931  ;;  %v935_v40 = vmul.f32 %v2870_v36, %v930_v37 }
 0xef0   :  { %v936_v41 = vmul.f32 %v2872_v38, %v932_v39 }
 0xef1   :  { %939 = vrot.lane.b32.xlu1 %v935_v40, %s3001_s19 }
 0xef2   :  { %941 = vrot.lane.b32.xlu0 %v936_v41, %s3001_s19 }
 0xf63   :  { %v940_v46 = vpop.permute.xlu1 %939 }
 0xf64   :  { %v942_v47 = vpop.permute.xlu0 %941  ;;  %v945_v48 = vadd.f32 %v940_v46, %v925_v44 }
 0xf65   :  { %v946_v49 = vadd.f32 %v942_v47, %v926_v45 }
 0xf66   :  { %2873 = vtanh.f32 %v945_v48  ;;  %v1061_v23 = vrot.slane %v945_v48, 7 }
 0xf67   :  { %2875 = vtanh.f32 %v946_v49  ;;  %v1062_v24 = vrot.slane %v946_v49, 7 }
 0xf73   :  { %v2874_v50 = vpop.eup %2873 }
 0xf74   :  { %v2876_v51 = vpop.eup %2875  ;;  %951 = vrot.lane.b32.xlu1 %v2874_v50, %s3000_s0 }
 0xf75   :  { %953 = vrot.lane.b32.xlu0 %v2876_v51, %s3000_s0 }
 0xfe6   :  { %v952_v52 = vpop.permute.xlu1 %951 }
 0xfe7   :  { %v954_v53 = vpop.permute.xlu0 %953  ;;  %v957_v54 = vmul.f32 %v2870_v36, %v952_v52 }
 0xfe8   :  { %v958_v55 = vmul.f32 %v2872_v38, %v954_v53 }
 0xfe9   :  { %v961_v56 = vrot.slane %v957_v54, 5 }
 0xfea   :  { %v962_v57 = vrot.slane %v958_v55, 4 }
 0xfec   :  { %v963_v58 = vsel %vm264_vm3, %v962_v57, %v961_v56 }
 0xfed   :  { %964 = vrot.lane.b32.xlu1 %v963_v58, %s3001_s19 }
0x105f   :  { %v965_v59 = vpop.permute.xlu1 %964 }
0x1060   :  { %2661 = vmatmul.mubr.msk.f32.vlgmr.msra.gmra.mxu1 %vm133_vm4, %v965_v59 }
0x1061   :  { %2682 = vmatprep.mubr.msk.f32.mxu1 %vm2999_vm0, %v2998_v0 }
0x1120   :  { %v1034_v60 = vpop.f32.mrf.mxu1 }
0x1121   :  { %v1039_v61 = vrot.slane %v1034_v60, 2  ;;  %v1040_v62 = vrot.slane %v1034_v60, 3 }
0x1122   :  { %v2662_v63 = vpop.f32.mrf.mxu1 }
0x1123   :  { %v1043_v2 = vadd.f32 %v1039_v61, %v3072_v14  ;;  %v1044_v3 = vadd.f32 %v1040_v62, %v3070_v10 }
0x1125   :  { %2877 = vtanh.f32 %v1043_v2  ;;  %v2467_v9 = vmul.f32 -1.442695, %v1043_v2  ;;  %v2468_v11 = vmul.f32 -1.442695, %v1044_v3 }
0x1126   :  { %2879 = vtanh.f32 %v1044_v3 }
0x1127   :  { %2881 = vpow2.f32 %v2467_v9  ;;  %v3219_v9 = vld [vmem:[#allocation3 + $0x38] sm:$0xff] }
0x1128   :  { %2883 = vpow2.f32 %v2468_v11  ;;  %v3225_v11 = vld [vmem:[#allocation3 + $0x30] sm:$0xff] }
0x1132   :  { %v2878_v5 = vpop.eup %2877 }
0x1133   :  { %v2880_v8 = vpop.eup %2879  ;;  %1069 = vrot.lane.b32.xlu0 %v2878_v5, %s3000_s0  ;;  %v3212_v5 = vld [vmem:[#allocation3 + $0x48] sm:$0xff] }
0x1134   :  { %1071 = vrot.lane.b32.xlu1 %v2880_v8, %s3000_s0  ;;  %v2882_v12 = vpop.eup %2881  ;;  %v3214_v8 = vld [vmem:[#allocation3 + $0x40] sm:$0xff]  ;;  %2675 = vmatpush3.msra.mxu1 %v3212_v5 }
0x1135   :  { %v2884_v13 = vpop.eup %2883  ;;  %v1051_v15 = vadd.f32 1.0, %v2882_v12  ;;  %2676 = vmatprep.subr.mxu1 %v2998_v0 }
0x1136   :  { %v1052_v16 = vadd.f32 1.0, %v2884_v13  ;;  %2677 = vmatpush3.msra.mxu1 %v3214_v8 }
0x1137   :  { %2885 = vrcp.f32 %v1051_v15  ;;  %2678 = vmatprep.subr.mxu1 %v2998_v0 }
0x1138   :  { %2887 = vrcp.f32 %v1052_v16  ;;  %2679 = vmatpush3.msra.mxu1 %v3219_v9 }
0x1139   :  { %2680 = vmatprep.subr.mxu1 %v2998_v0 }
0x113a   :  { %2681 = vmatpush3.msra.mxu1 %v3225_v11 }
0x113b   :  { %2696 = vmatprep.subr.mxu1 %v2998_v0 }
0x1144   :  { %v2886_v17 = vpop.eup %2885 }
0x1145   :  { %v2888_v19 = vpop.eup %2887  ;;  %v1065_v25 = vmul.f32 %v2886_v17, %v1061_v23  ;;  %v3251_v23 = vld [vmem:[#allocation3 + $0x50] ss:$0 sm:$0xff] }
0x1146   :  { %v1066_v26 = vmul.f32 %v2888_v19, %v1062_v24 }
0x11a5   :  { %v1070_v18 = vpop.permute.xlu0 %1069 }
0x11a6   :  { %v1072_v20 = vpop.permute.xlu1 %1071  ;;  %v1075_v21 = vmul.f32 %v2886_v17, %v1070_v18 }
0x11a7   :  { %v1076_v22 = vmul.f32 %v2888_v19, %v1072_v20 }
0x11a8   :  { %1079 = vrot.lane.b32.xlu0 %v1075_v21, %s3001_s19 }
0x11a9   :  { %1081 = vrot.lane.b32.xlu1 %v1076_v22, %s3001_s19 }
0x121a   :  { %v1080_v27 = vpop.permute.xlu0 %1079 }
0x121b   :  { %v1082_v1 = vpop.permute.xlu1 %1081  ;;  %v1085_v28 = vadd.f32 %v1080_v27, %v1065_v25 }
0x121c   :  { %v1086_v29 = vadd.f32 %v1082_v1, %v1066_v26 }
0x121d   :  { %2889 = vtanh.f32 %v1085_v28  ;;  %v1201_v55 = vrot.slane %v1085_v28, 7 }
0x121e   :  { %2891 = vtanh.f32 %v1086_v29  ;;  %v1202_v56 = vrot.slane %v1086_v29, 7 }
0x122a   :  { %v2890_v30 = vpop.eup %2889 }
0x122b   :  { %v2892_v4 = vpop.eup %2891  ;;  %1091 = vrot.lane.b32.xlu0 %v2890_v30, %s3000_s0 }
0x122c   :  { %1093 = vrot.lane.b32.xlu1 %v2892_v4, %s3000_s0 }
0x129d   :  { %v1092_v31 = vpop.permute.xlu0 %1091 }
0x129e   :  { %v1094_v6 = vpop.permute.xlu1 %1093  ;;  %v1097_v7 = vmul.f32 %v2886_v17, %v1092_v31 }
0x129f   :  { %v1098_v32 = vmul.f32 %v2888_v19, %v1094_v6 }
0x12a0   :  { %v1101_v33 = vrot.slane %v1097_v7, 6 }
0x12a1   :  { %v1102_v34 = vrot.slane %v1098_v32, 5 }
0x12a3   :  { %v1103_v35 = vsel %vm264_vm3, %v1102_v34, %v1101_v33 }
0x12a4   :  { %1104 = vrot.lane.b32.xlu0 %v1103_v35, %s3001_s19 }
0x1316   :  { %v1105_v36 = vpop.permute.xlu0 %1104 }
0x1317   :  { %2672 = vmatmul.mubr.msk.f32.vlgmr.msra.gmra.mxu0 %vm133_vm4, %v1105_v36 }
0x1318   :  { %2693 = vmatprep.mubr.msk.f32.mxu0 %vm2999_vm0, %v2998_v0  ;;  %2686 = vmatpush3.msra.mxu0 %v3212_v5 }
0x1319   :  { %2687 = vmatprep.subr.mxu0 %v2998_v0 }
0x131a   :  { %2688 = vmatpush3.msra.mxu0 %v3214_v8 }
0x131b   :  { %2689 = vmatprep.subr.mxu0 %v2998_v0 }
0x131c   :  { %2690 = vmatpush3.msra.mxu0 %v3219_v9 }
0x131d   :  { %2691 = vmatprep.subr.mxu0 %v2998_v0 }
0x131e   :  { %2692 = vmatpush3.msra.mxu0 %v3225_v11 }
0x131f   :  { %2707 = vmatprep.subr.mxu0 %v2998_v0 }
0x13d7   :  { %v1174_v37 = vpop.f32.mrf.mxu0 }
0x13d8   :  { %v1179_v38 = vrot.slane %v1174_v37, 1  ;;  %v1180_v39 = vrot.slane %v1174_v37, 2 }
0x13d9   :  { %v2673_v40 = vpop.f32.mrf.mxu0 }
0x13da   :  { %v1183_v41 = vadd.f32 %v1179_v38, %v3072_v14  ;;  %v1184_v42 = vadd.f32 %v1180_v39, %v3070_v10 }
0x13dc   :  { %2893 = vtanh.f32 %v1183_v41  ;;  %v2470_v45 = vmul.f32 -1.442695, %v1183_v41  ;;  %v2471_v46 = vmul.f32 -1.442695, %v1184_v42 }
0x13dd   :  { %2895 = vtanh.f32 %v1184_v42 }
0x13de   :  { %2897 = vpow2.f32 %v2470_v45 }
0x13df   :  { %2899 = vpow2.f32 %v2471_v46 }
0x13e9   :  { %v2894_v43 = vpop.eup %2893 }
0x13ea   :  { %v2896_v44 = vpop.eup %2895  ;;  %1209 = vrot.lane.b32.xlu1 %v2894_v43, %s3000_s0 }
0x13eb   :  { %1211 = vrot.lane.b32.xlu0 %v2896_v44, %s3000_s0  ;;  %v2898_v47 = vpop.eup %2897 }
0x13ec   :  { %v2900_v48 = vpop.eup %2899  ;;  %v1191_v49 = vadd.f32 1.0, %v2898_v47 }
0x13ed   :  { %v1192_v50 = vadd.f32 1.0, %v2900_v48 }
0x13ee   :  { %2901 = vrcp.f32 %v1191_v49 }
0x13ef   :  { %2903 = vrcp.f32 %v1192_v50 }
0x13fb   :  { %v2902_v14 = vpop.eup %2901 }
0x13fc   :  { %v2904_v51 = vpop.eup %2903  ;;  %v1205_v57 = vmul.f32 %v2902_v14, %v1201_v55 }
0x13fd   :  { %v1206_v58 = vmul.f32 %v2904_v51, %v1202_v56 }
0x145c   :  { %v1210_v10 = vpop.permute.xlu1 %1209 }
0x145d   :  { %v1212_v52 = vpop.permute.xlu0 %1211  ;;  %v1215_v53 = vmul.f32 %v2902_v14, %v1210_v10 }
0x145e   :  { %v1216_v54 = vmul.f32 %v2904_v51, %v1212_v52 }
0x145f   :  { %1219 = vrot.lane.b32.xlu1 %v1215_v53, %s3001_s19 }
0x1460   :  { %1221 = vrot.lane.b32.xlu0 %v1216_v54, %s3001_s19 }
0x14d1   :  { %v1220_v59 = vpop.permute.xlu1 %1219 }
0x14d2   :  { %v1222_v60 = vpop.permute.xlu0 %1221  ;;  %v1225_v61 = vadd.f32 %v1220_v59, %v1205_v57 }
0x14d3   :  { %v1226_v62 = vadd.f32 %v1222_v60, %v1206_v58 }
0x14d4   :  { %2905 = vtanh.f32 %v1225_v61  ;;  %v1331_v63 = vrot.slane %v1225_v61, 7 }
0x14d5   :  { %2907 = vtanh.f32 %v1226_v62  ;;  %v1332_v2 = vrot.slane %v1226_v62, 6 }
0x14d7   :  { %v1333_v3 = vsel %vm264_vm3, %v1332_v2, %v1331_v63 }
0x14e1   :  { %v2906_v12 = vpop.eup %2905 }
0x14e2   :  { %v2908_v13 = vpop.eup %2907  ;;  %1231 = vrot.lane.b32.xlu1 %v2906_v12, %s3000_s0 }
0x14e3   :  { %1233 = vrot.lane.b32.xlu0 %v2908_v13, %s3000_s0 }
0x1554   :  { %v1232_v15 = vpop.permute.xlu1 %1231 }
0x1555   :  { %v1234_v16 = vpop.permute.xlu0 %1233  ;;  %v1237_v17 = vmul.f32 %v2902_v14, %v1232_v15 }
0x1556   :  { %v1238_v18 = vmul.f32 %v2904_v51, %v1234_v16 }
0x1557   :  { %v1245_v19 = vrot.slane %v1237_v17, 7 }
0x1558   :  { %v1246_v20 = vrot.slane %v1238_v18, 6 }
0x155a   :  { %v1247_v21 = vsel %vm264_vm3, %v1246_v20, %v1245_v19 }
0x155b   :  { %1248 = vrot.lane.b32.xlu1 %v1247_v21, %s3001_s19 }
0x15cd   :  { %v1249_v22 = vpop.permute.xlu1 %1248 }
0x15ce   :  { %2683 = vmatmul.mubr.msk.f32.vlgmr.msra.gmra.mxu1 %vm133_vm4, %v1249_v22 }
0x15cf   :  { %2697 = vmatpush3.msra.mxu1 %v3212_v5  ;;  %2704 = vmatprep.mubr.msk.f32.mxu1 %vm2999_vm0, %v2998_v0 }
0x15d0   :  { %2698 = vmatprep.subr.mxu1 %v2998_v0 }
0x15d1   :  { %2699 = vmatpush3.msra.mxu1 %v3214_v8 }
0x15d2   :  { %2700 = vmatprep.subr.mxu1 %v2998_v0 }
0x15d3   :  { %2701 = vmatpush3.msra.mxu1 %v3219_v9 }
0x15d4   :  { %2702 = vmatprep.subr.mxu1 %v2998_v0 }
0x15d5   :  { %2703 = vmatpush3.msra.mxu1 %v3225_v11 }
0x15d6   :  { %2718 = vmatprep.subr.mxu1 %v2998_v0 }
0x168e   :  { %v1318_v24 = vpop.f32.mrf.mxu1 }
0x168f   :  { %v1319_v25 = vadd.f32 %v3251_v23, %v1318_v24 }
0x1690   :  { %v2684_v26 = vpop.f32.mrf.mxu1 }
0x1691   :  { %2909 = vtanh.f32 %v1319_v25  ;;  %v2474_v1 = vmul.f32 -1.442695, %v1319_v25 }
0x1693   :  { %2911 = vpow2.f32 %v2474_v1 }
0x169e   :  { %v2910_v27 = vpop.eup %2909 }
0x169f   :  { %1337 = vrot.lane.b32.xlu0 %v2910_v27, %s3000_s0 }
0x16a0   :  { %v2912_v28 = vpop.eup %2911 }
0x16a1   :  { %v1325_v29 = vadd.f32 1.0, %v2912_v28 }
0x16a3   :  { %2913 = vrcp.f32 %v1325_v29 }
0x16b0   :  { %v2914_v30 = vpop.eup %2913 }
0x16b1   :  { %v1335_v6 = vmul.f32 %v2914_v30, %v1333_v3 }
0x1711   :  { %v1338_v4 = vpop.permute.xlu0 %1337 }
0x1712   :  { %v1340_v31 = vmul.f32 %v2914_v30, %v1338_v4 }
0x1714   :  { %1342 = vrot.lane.b32.xlu1 %v1340_v31, %s3001_s19 }
0x1786   :  { %v1343_v7 = vpop.permute.xlu1 %1342 }
0x1787   :  { %v1345_v32 = vadd.f32 %v1343_v7, %v1335_v6 }
0x1789   :  { %2915 = vtanh.f32 %v1345_v32 }
0x1796   :  { %v2916_v33 = vpop.eup %2915 }
0x1797   :  { %1348 = vrot.lane.b32.xlu0 %v2916_v33, %s3000_s0 }
0x1809   :  { %v1349_v34 = vpop.permute.xlu0 %1348 }
0x180a   :  { %v3257_v35 = vmul.f32 %v2914_v30, %v1349_v34 }
0x180c   :  { %1392 = vrot.lane.b32.xlu1 %v3257_v35, %s3001_s19 }
0x187e   :  { %v1393_v36 = vpop.permute.xlu1 %1392 }
0x187f   :  { %2694 = vmatmul.mubr.msk.f32.vlgmr.msra.gmra.mxu0 %vm133_vm4, %v1393_v36 }
0x1880   :  { %2708 = vmatpush3.msra.mxu0 %v3212_v5  ;;  %2715 = vmatprep.mubr.msk.f32.mxu0 %vm2999_vm0, %v2998_v0 }
0x1881   :  { %2709 = vmatprep.subr.mxu0 %v2998_v0 }
0x1882   :  { %2710 = vmatpush3.msra.mxu0 %v3214_v8 }
0x1883   :  { %2711 = vmatprep.subr.mxu0 %v2998_v0 }
0x1884   :  { %2712 = vmatpush3.msra.mxu0 %v3219_v9 }
0x1885   :  { %2713 = vmatprep.subr.mxu0 %v2998_v0 }
0x1886   :  { %2714 = vmatpush3.msra.mxu0 %v3225_v11 }
0x1887   :  { %2729 = vmatprep.subr.mxu0 %v2998_v0 }
0x193f   :  { %v1462_v37 = vpop.f32.mrf.mxu0 }
0x1940   :  { %v1463_v38 = vadd.f32 %v3251_v23, %v1462_v37 }
0x1941   :  { %v2695_v39 = vpop.f32.mrf.mxu0 }
0x1942   :  { %2917 = vtanh.f32 %v1463_v38  ;;  %v2476_v41 = vmul.f32 -1.442695, %v1463_v38 }
0x1944   :  { %2919 = vpow2.f32 %v2476_v41 }
0x194f   :  { %v2918_v40 = vpop.eup %2917 }
0x1950   :  { %1475 = vrot.lane.b32.xlu0 %v2918_v40, %s3000_s0 }
0x1951   :  { %v2920_v42 = vpop.eup %2919 }
0x1952   :  { %v1469_v43 = vadd.f32 1.0, %v2920_v42 }
0x1954   :  { %2921 = vrcp.f32 %v1469_v43 }
0x1961   :  { %v2922_v44 = vpop.eup %2921 }
0x1962   :  { %v1473_v47 = vmul.f32 %v2922_v44, %v1345_v32 }
0x19c2   :  { %v1476_v45 = vpop.permute.xlu0 %1475 }
0x19c3   :  { %v1478_v46 = vmul.f32 %v2922_v44, %v1476_v45 }
0x19c5   :  { %1480 = vrot.lane.b32.xlu1 %v1478_v46, %s3001_s19 }
0x1a37   :  { %v1481_v48 = vpop.permute.xlu1 %1480 }
0x1a38   :  { %v1483_v49 = vadd.f32 %v1481_v48, %v1473_v47 }
0x1a3a   :  { %2923 = vtanh.f32 %v1483_v49 }
0x1a47   :  { %v2924_v50 = vpop.eup %2923 }
0x1a48   :  { %1486 = vrot.lane.b32.xlu0 %v2924_v50, %s3000_s0 }
0x1aba   :  { %v1487_v14 = vpop.permute.xlu0 %1486 }
0x1abb   :  { %v3276_v10 = vmul.f32 %v2922_v44, %v1487_v14 }
0x1abd   :  { %1529 = vrot.lane.b32.xlu1 %v3276_v10, %s3001_s19 }
0x1b2f   :  { %v1530_v51 = vpop.permute.xlu1 %1529 }
0x1b30   :  { %2705 = vmatmul.mubr.msk.f32.vlgmr.msra.gmra.mxu1 %vm133_vm4, %v1530_v51 }
0x1b31   :  { %2719 = vmatpush3.msra.mxu1 %v3212_v5  ;;  %2726 = vmatprep.mubr.msk.f32.mxu1 %vm2999_vm0, %v2998_v0 }
0x1b32   :  { %2720 = vmatprep.subr.mxu1 %v2998_v0 }
0x1b33   :  { %2721 = vmatpush3.msra.mxu1 %v3214_v8 }
0x1b34   :  { %2722 = vmatprep.subr.mxu1 %v2998_v0 }
0x1b35   :  { %2723 = vmatpush3.msra.mxu1 %v3219_v9 }
0x1b36   :  { %2724 = vmatprep.subr.mxu1 %v2998_v0 }
0x1b37   :  { %2725 = vmatpush3.msra.mxu1 %v3225_v11 }
0x1b38   :  { %2740 = vmatprep.subr.mxu1 %v2998_v0 }
0x1bf0   :  { %v1599_v52 = vpop.f32.mrf.mxu1 }
0x1bf1   :  { %v1600_v53 = vadd.f32 %v3251_v23, %v1599_v52 }
0x1bf2   :  { %v2706_v54 = vpop.f32.mrf.mxu1 }
0x1bf3   :  { %2925 = vtanh.f32 %v1600_v53  ;;  %v2478_v56 = vmul.f32 -1.442695, %v1600_v53 }
0x1bf5   :  { %2927 = vpow2.f32 %v2478_v56 }
0x1c00   :  { %v2926_v55 = vpop.eup %2925 }
0x1c01   :  { %1612 = vrot.lane.b32.xlu0 %v2926_v55, %s3000_s0 }
0x1c02   :  { %v2928_v57 = vpop.eup %2927 }
0x1c03   :  { %v1606_v58 = vadd.f32 1.0, %v2928_v57 }
0x1c05   :  { %2929 = vrcp.f32 %v1606_v58 }
0x1c12   :  { %v2930_v59 = vpop.eup %2929 }
0x1c13   :  { %v1610_v62 = vmul.f32 %v2930_v59, %v1483_v49 }
0x1c73   :  { %v1613_v60 = vpop.permute.xlu0 %1612 }
0x1c74   :  { %v1615_v61 = vmul.f32 %v2930_v59, %v1613_v60 }
0x1c76   :  { %1617 = vrot.lane.b32.xlu1 %v1615_v61, %s3001_s19 }
0x1ce8   :  { %v1618_v63 = vpop.permute.xlu1 %1617 }
0x1ce9   :  { %v1620_v2 = vadd.f32 %v1618_v63, %v1610_v62 }
0x1ceb   :  { %2931 = vtanh.f32 %v1620_v2 }
0x1cf8   :  { %v2932_v3 = vpop.eup %2931 }
0x1cf9   :  { %1623 = vrot.lane.b32.xlu0 %v2932_v3, %s3000_s0 }
0x1d6b   :  { %v1624_v12 = vpop.permute.xlu0 %1623 }
0x1d6c   :  { %v3295_v13 = vmul.f32 %v2930_v59, %v1624_v12 }
0x1d6e   :  { %1666 = vrot.lane.b32.xlu1 %v3295_v13, %s3001_s19 }
0x1de0   :  { %v1667_v15 = vpop.permute.xlu1 %1666 }
0x1de1   :  { %2716 = vmatmul.mubr.msk.f32.vlgmr.msra.gmra.mxu0 %vm133_vm4, %v1667_v15 }
0x1de2   :  { %2730 = vmatpush3.msra.mxu0 %v3212_v5  ;;  %2737 = vmatprep.mubr.msk.f32.mxu0 %vm2999_vm0, %v2998_v0 }
0x1de3   :  { %2731 = vmatprep.subr.mxu0 %v2998_v0 }
0x1de4   :  { %2732 = vmatpush3.msra.mxu0 %v3214_v8 }
0x1de5   :  { %2733 = vmatprep.subr.mxu0 %v2998_v0 }
0x1de6   :  { %2734 = vmatpush3.msra.mxu0 %v3219_v9 }
0x1de7   :  { %2735 = vmatprep.subr.mxu0 %v2998_v0 }
0x1de8   :  { %2736 = vmatpush3.msra.mxu0 %v3225_v11 }
0x1de9   :  { %2751 = vmatprep.subr.mxu0 %v2998_v0 }
0x1ea1   :  { %v1736_v16 = vpop.f32.mrf.mxu0 }
0x1ea2   :  { %v1737_v17 = vadd.f32 %v3251_v23, %v1736_v16 }
0x1ea3   :  { %v2717_v18 = vpop.f32.mrf.mxu0 }
0x1ea4   :  { %2933 = vtanh.f32 %v1737_v17  ;;  %v2480_v20 = vmul.f32 -1.442695, %v1737_v17 }
0x1ea6   :  { %2935 = vpow2.f32 %v2480_v20 }
0x1eb1   :  { %v2934_v19 = vpop.eup %2933 }
0x1eb2   :  { %1749 = vrot.lane.b32.xlu0 %v2934_v19, %s3000_s0 }
0x1eb3   :  { %v2936_v21 = vpop.eup %2935 }
0x1eb4   :  { %v1743_v22 = vadd.f32 1.0, %v2936_v21 }
0x1eb6   :  { %2937 = vrcp.f32 %v1743_v22 }
0x1ec3   :  { %v2938_v24 = vpop.eup %2937 }
0x1ec4   :  { %v1747_v27 = vmul.f32 %v2938_v24, %v1620_v2 }
0x1f24   :  { %v1750_v25 = vpop.permute.xlu0 %1749 }
0x1f25   :  { %v1752_v26 = vmul.f32 %v2938_v24, %v1750_v25 }
0x1f27   :  { %1754 = vrot.lane.b32.xlu1 %v1752_v26, %s3001_s19 }
0x1f99   :  { %v1755_v1 = vpop.permute.xlu1 %1754 }
0x1f9a   :  { %v1757_v28 = vadd.f32 %v1755_v1, %v1747_v27 }
0x1f9c   :  { %2939 = vtanh.f32 %v1757_v28 }
0x1fa9   :  { %v2940_v29 = vpop.eup %2939 }
0x1faa   :  { %1760 = vrot.lane.b32.xlu0 %v2940_v29, %s3000_s0 }
0x201c   :  { %v1761_v30 = vpop.permute.xlu0 %1760 }
0x201d   :  { %v3314_v4 = vmul.f32 %v2938_v24, %v1761_v30 }
0x201f   :  { %1803 = vrot.lane.b32.xlu1 %v3314_v4, %s3001_s19 }
0x2091   :  { %v1804_v31 = vpop.permute.xlu1 %1803 }
0x2092   :  { %2727 = vmatmul.mubr.msk.f32.vlgmr.msra.gmra.mxu1 %vm133_vm4, %v1804_v31  ;;  %v3002_v31 = vmov 1966171168  }
0x2093   :  { %2741 = vmatpush3.msra.mxu1 %v3212_v5  ;;  %2748 = vmatprep.mubr.msk.f32.mxu1 %vm2999_vm0, %v2998_v0 }
0x2094   :  { %2742 = vmatprep.subr.mxu1 %v2998_v0 }
0x2095   :  { %2743 = vmatpush3.msra.mxu1 %v3214_v8 }
0x2096   :  { %2744 = vmatprep.subr.mxu1 %v2998_v0 }
0x2097   :  { %2745 = vmatpush3.msra.mxu1 %v3219_v9 }
0x2098   :  { %2746 = vmatprep.subr.mxu1 %v2998_v0 }
0x2099   :  { %2747 = vmatpush3.msra.mxu1 %v3225_v11 }
0x2152   :  { %v1873_v6 = vpop.f32.mrf.mxu1 }
0x2153   :  { %v1874_v7 = vadd.f32 %v3251_v23, %v1873_v6  ;;  %v1354_v6 = vunpack.c.l.s4 %v3002_v31  ;;  %v39_v31 = vld [vmem:[#allocation3 + $0x70] sm:$0xff] }
0x2154   :  { %v2728_v32 = vpop.f32.mrf.mxu1  ;;  %2762 = vmatprep.subr.mxu1 %v39_v31 }
0x2155   :  { %2941 = vtanh.f32 %v1874_v7  ;;  %v2482_v34 = vmul.f32 -1.442695, %v1874_v7  ;;  %v1356_v7 = vlaneseq  ;;  %v1355_v32 = vunpack.c.0.s8 %v1354_v6 }
0x2157   :  { %2943 = vpow2.f32 %v2482_v34 }
0x2162   :  { %v2942_v33 = vpop.eup %2941 }
0x2163   :  { %1886 = vrot.lane.b32.xlu0 %v2942_v33, %s3000_s0  ;;  %v1357_v33 = vshrl.u32 %v1356_v7, 7  ;;  %v38_v7 = vld [vmem:[#allocation3 + $0x68] sm:$0xff] }
0x2164   :  { %v2944_v36 = vpop.eup %2943 }
0x2165   :  { %v1880_v37 = vadd.f32 1.0, %v2944_v36  ;;  %v3366_v34 = vsub.s32 %v1355_v32, %v1357_v33 }
0x2167   :  { %2945 = vrcp.f32 %v1880_v37 }
0x2174   :  { %v2946_v38 = vpop.eup %2945 }
0x2175   :  { %v1884_v41 = vmul.f32 %v2946_v38, %v1757_v28 }
0x21d5   :  { %v1887_v39 = vpop.permute.xlu0 %1886 }
0x21d6   :  { %v1889_v40 = vmul.f32 %v2946_v38, %v1887_v39  ;;  %v1634_v39 = vrot.slane %v3295_v13, %v3366_v34 }
0x21d8   :  { %1891 = vrot.lane.b32.xlu1 %v1889_v40, %s3001_s19 }
0x224a   :  { %v1892_v42 = vpop.permute.xlu1 %1891 }
0x224b   :  { %v1894_v43 = vadd.f32 %v1892_v42, %v1884_v41  ;;  %v3376_v41 = vsub.s32 0, %v1357_v33  ;;  %v1642_v42 = vrot.slane %v1634_v39, %v3366_v34  ;;  %v37_v33 = vld [vmem:[#allocation3 + $0x60] sm:$0xff] }
0x224d   :  { %2947 = vtanh.f32 %v1894_v43  ;;  %v1653_v13 = vrot.slane %v1642_v42, %v3376_v41 }
0x225a   :  { %v2948_v44 = vpop.eup %2947 }
0x225b   :  { %1897 = vrot.lane.b32.xlu0 %v2948_v44, %s3000_s0 }
0x22cd   :  { %v1898_v45 = vpop.permute.xlu0 %1897 }
0x22ce   :  { %v3332_v46 = vmul.f32 %v2946_v38, %v1898_v45 }
0x22d0   :  { %1940 = vrot.lane.b32.xlu1 %v3332_v46, %s3001_s19 }
0x2342   :  { %v1941_v47 = vpop.permute.xlu1 %1940 }
0x2343   :  { %2738 = vmatmul.mubr.msk.f32.vlgmr.msra.gmra.mxu0 %vm133_vm4, %v1941_v47 }
0x2344   :  { %2752 = vmatpush3.msra.mxu0 %v3212_v5  ;;  %2759 = vmatprep.mubr.msk.f32.mxu0 %vm2999_vm0, %v2998_v0 }
0x2345   :  { %2753 = vmatprep.subr.mxu0 %v2998_v0 }
0x2346   :  { %2754 = vmatpush3.msra.mxu0 %v3214_v8 }
0x2347   :  { %2755 = vmatprep.subr.mxu0 %v2998_v0 }
0x2348   :  { %2756 = vmatpush3.msra.mxu0 %v3219_v9 }
0x2349   :  { %2757 = vmatprep.subr.mxu0 %v2998_v0 }
0x234a   :  { %2758 = vmatpush3.msra.mxu0 %v3225_v11 }
0x2403   :  { %v2010_v48 = vpop.f32.mrf.mxu0 }
0x2404   :  { %v2011_v49 = vadd.f32 %v3251_v23, %v2010_v48 }
0x2405   :  { %v2739_v50 = vpop.f32.mrf.mxu0 }
0x2406   :  { %2949 = vtanh.f32 %v2011_v49  ;;  %v2484_v14 = vmul.f32 -1.442695, %v2011_v49 }
0x2408   :  { %2951 = vpow2.f32 %v2484_v14 }
0x2413   :  { %v2950_v5 = vpop.eup %2949 }
0x2414   :  { %2023 = vrot.lane.b32.xlu0 %v2950_v5, %s3000_s0 }
0x2415   :  { %v2952_v51 = vpop.eup %2951 }
0x2416   :  { %v2017_v8 = vadd.f32 1.0, %v2952_v51 }
0x2418   :  { %2953 = vrcp.f32 %v2017_v8 }
0x2425   :  { %v2954_v52 = vpop.eup %2953 }
0x2426   :  { %v2021_v0 = vmul.f32 %v2954_v52, %v1894_v43  ;;  %v1908_v43 = vrot.slane %v3332_v46, %v3366_v34  ;;  %v1635_v46 = vcombine.high %v1634_v39, %v1634_v39 }
0x2428   :  { %v1916_v44 = vrot.slane %v1908_v43, %v3366_v34  ;;  %v1909_v14 = vcombine.high %v1908_v43, %v1908_v43  ;;  %v1649_v8 = vrot.slane %v1635_v46, %v3366_v34  ;;  %v2489_v46 = vld [vmem:[#allocation3 + $0x78] ss:$0 sm:$0xff] }
0x242a   :  { %v1927_v49 = vrot.slane %v1916_v44, %v3376_v41 }
0x2486   :  { %v2024_v53 = vpop.permute.xlu0 %2023 }
0x2487   :  { %v2026_v9 = vmul.f32 %v2954_v52, %v2024_v53 }
0x2489   :  { %2028 = vrot.lane.b32.xlu1 %v2026_v9, %s3001_s19  ;;  %v1657_v9 = vrot.slane %v1649_v8, %v3376_v41 }
0x24fb   :  { %v2029_v11 = vpop.permute.xlu1 %2028 }
0x24fc   :  { %v2031_v54 = vadd.f32 %v2029_v11, %v2021_v0 }
0x24fe   :  { %2955 = vtanh.f32 %v2031_v54 }
0x250b   :  { %v2956_v55 = vpop.eup %2955 }
0x250c   :  { %2034 = vrot.lane.b32.xlu0 %v2956_v55, %s3000_s0 }
0x257e   :  { %v2035_v56 = vpop.permute.xlu0 %2034 }
0x257f   :  { %v3350_v57 = vmul.f32 %v2954_v52, %v2035_v56  ;;  %v1923_v52 = vrot.slane %v1909_v14, %v3366_v34 }
0x2581   :  { %2077 = vrot.lane.b32.xlu1 %v3350_v57, %s3001_s19  ;;  %v1931_v11 = vrot.slane %v1923_v52, %v3376_v41 }
0x25f3   :  { %v2078_v58 = vpop.permute.xlu1 %2077 }
0x25f4   :  { %2749 = vmatmul.mubr.msk.f32.vlgmr.msra.gmra.mxu1 %vm133_vm4, %v2078_v58 }
0x25f5   :  { %2763 = vmatpush3.msra.mxu1 %v39_v31 }
0x25f6   :  { %2764 = vmatprep.subr.mxu1 %v38_v7 }
0x25f7   :  { %2765 = vmatpush3.msra.mxu1 %v38_v7 }
0x25f8   :  { %2766 = vmatprep.subr.mxu1 %v37_v33 }
0x25f9   :  { %2767 = vmatpush3.msra.mxu1 %v37_v33 }
0x26b4   :  { %v2147_v59 = vpop.f32.mrf.mxu1 }
0x26b5   :  { %v2148_v60 = vadd.f32 %v3251_v23, %v2147_v59 }
0x26b6   :  { %v2750_v61 = vpop.f32.mrf.mxu1 }
0x26b7   :  { %2957 = vtanh.f32 %v2148_v60  ;;  %v2486_v63 = vmul.f32 -1.442695, %v2148_v60  ;;  %v1497_v61 = vrot.slane %v3276_v10, %v3366_v34 }
0x26b9   :  { %2959 = vpow2.f32 %v2486_v63  ;;  %v1505_v63 = vrot.slane %v1497_v61, %v3366_v34 }
0x26bb   :  { %v1516_v10 = vrot.slane %v1505_v63, %v3376_v41 }
0x26c4   :  { %v2958_v62 = vpop.eup %2957 }
0x26c5   :  { %2160 = vrot.lane.b32.xlu0 %v2958_v62, %s3000_s0 }
0x26c6   :  { %v2960_v2 = vpop.eup %2959 }
0x26c7   :  { %v2154_v3 = vadd.f32 1.0, %v2960_v2  ;;  %v1771_v2 = vrot.slane %v3314_v4, %v3366_v34 }
0x26c9   :  { %2961 = vrcp.f32 %v2154_v3 }
0x26d6   :  { %v2962_v12 = vpop.eup %2961 }
0x26d7   :  { %v2158_v17 = vmul.f32 %v2962_v12, %v2031_v54 }
0x2737   :  { %v2161_v15 = vpop.permute.xlu0 %2160 }
0x2738   :  { %v2163_v16 = vmul.f32 %v2962_v12, %v2161_v15  ;;  %v1779_v15 = vrot.slane %v1771_v2, %v3366_v34 }
0x273a   :  { %2165 = vrot.lane.b32.xlu1 %v2163_v16, %s3001_s19  ;;  %v2045_v16 = vrot.slane %v3350_v57, %v3366_v34 }
0x273c   :  { %v2053_v4 = vrot.slane %v2045_v16, %v3366_v34 }
0x273e   :  { %v2064_v57 = vrot.slane %v2053_v4, %v3376_v41 }
0x27ac   :  { %v2166_v18 = vpop.permute.xlu1 %2165 }
0x27ad   :  { %v3358_v19 = vadd.f32 %v2166_v18, %v2158_v17  ;;  %v1498_v18 = vcombine.high %v1497_v61, %v1497_v61 }
0x27af   :  { %2963 = vtanh.f32 %v3358_v19 }
0x27bc   :  { %v2964_v20 = vpop.eup %2963 }
0x27bd   :  { %2171 = vrot.lane.b32.xlu0 %v2964_v20, %s3000_s0 }
0x282f   :  { %v2172_v21 = vpop.permute.xlu0 %2171 }
0x2830   :  { %v2174_v22 = vmul.f32 %v2962_v12, %v2172_v21  ;;  %v1772_v21 = vcombine.high %v1771_v2, %v1771_v2 }
0x2832   :  { %2214 = vrot.lane.b32.xlu1 %v2174_v22, %s3001_s19  ;;  %v2182_v45 = vrot.slane %v2174_v22, %v3366_v34  ;;  %v1512_v22 = vrot.slane %v1498_v18, %v3366_v34 }
0x2834   :  { %v2190_v48 = vrot.slane %v2182_v45, %v3366_v34  ;;  %v2183_v53 = vcombine.high %v2182_v45, %v2182_v45 }
0x2836   :  { %v2201_v50 = vrot.slane %v2190_v48, %v3376_v41  ;;  %v2197_v0 = vrot.slane %v2183_v53, %v3366_v34 }
0x2838   :  { %v2205_v54 = vrot.slane %v2197_v0, %v3376_v41 }
0x28a4   :  { %v2215_v24 = vpop.permute.xlu1 %2214 }
0x28a5   :  { %2760 = vmatmul.mubr.msk.f32.vlgmr.msra.gmra.mxu0 %vm133_vm4, %v2215_v24 }
0x2965   :  { %v2284_v25 = vpop.f32.mrf.mxu0 }
0x2966   :  { %v2285_v26 = vadd.f32 %v3251_v23, %v2284_v25  ;;  %v1359_v23 = vrot.slane %v3257_v35, %v3366_v34  ;;  %v2046_v25 = vcombine.high %v2045_v16, %v2045_v16 }
0x2967   :  { %v2761_v27 = vpop.f32.mrf.mxu0 }
0x2968   :  { %2965 = vtanh.f32 %v2285_v26  ;;  %v2488_v28 = vmul.f32 -1.442695, %v2285_v26  ;;  %v1367_v38 = vrot.slane %v1359_v23, %v3366_v34  ;;  %v1360_v47 = vcombine.high %v1359_v23, %v1359_v23 }
0x2969   :  { %v1520_v26 = vrot.slane %v1512_v22, %v3376_v41  ;;  %v1786_v27 = vrot.slane %v1772_v21, %v3366_v34 }
0x296a   :  { %2967 = vpow2.f32 %v2488_v28  ;;  %v1378_v35 = vrot.slane %v1367_v38, %v3376_v41  ;;  %v1374_v5 = vrot.slane %v1360_v47, %v3366_v34  ;;  %v2060_v28 = vrot.slane %v2046_v25, %v3366_v34  ;;  %v36_v38 = vld [vmem:[#allocation3 + $0x58] sm:$0xff] }
0x296b   :  { %2768 = vmatprep.subr.mxu1 %v36_v38 }
0x296c   :  { %v1382_v51 = vrot.slane %v1374_v5, %v3376_v41  ;;  %2769 = vmatpush3.msra.mxu1 %v36_v38 }
0x2975   :  { %v2966_v1 = vpop.eup %2965 }
0x2976   :  { %2297 = vrot.lane.b32.xlu0 %v2966_v1, %s3000_s0 }
0x2977   :  { %v2968_v29 = vpop.eup %2967 }
0x2978   :  { %v2291_v30 = vadd.f32 1.0, %v2968_v29  ;;  %v1794_v29 = vrot.slane %v1786_v27, %v3376_v41 }
0x297a   :  { %2969 = vrcp.f32 %v2291_v30  ;;  %v2068_v30 = vrot.slane %v2060_v28, %v3376_v41 }
0x2987   :  { %v3370_v36 = vpop.eup %2969 }
0x2988   :  { %v2295_v55 = vmul.f32 %v3370_v36, %v3358_v19  ;;  %v1790_v19 = vrot.slane %v1779_v15, %v3376_v41 }
0x29e8   :  { %v2298_v37 = vpop.permute.xlu0 %2297 }
0x29e9   :  { %v2300_v40 = vmul.f32 %v3370_v36, %v2298_v37 }
0x29eb   :  { %2302 = vrot.lane.b32.xlu1 %v2300_v40, %s3001_s19 }
0x29ef   :  { %1383 = vrot.lane.b32.xlu1 %v1378_v35, %s3001_s19 }
0x29f3   :  { %1658 = vrot.lane.b32.xlu1 %v1653_v13, %s3001_s19 }
0x29f7   :  { %1932 = vrot.lane.b32.xlu1 %v1927_v49, %s3001_s19 }
0x29fb   :  { %2206 = vrot.lane.b32.xlu1 %v2201_v50, %s3001_s19 }
0x29ff   :  { %1385 = vrot.lane.b32.xlu1 %v1382_v51, %s3001_s19 }
0x2a03   :  { %1660 = vrot.lane.b32.xlu1 %v1657_v9, %s3001_s19 }
0x2a07   :  { %1934 = vrot.lane.b32.xlu1 %v1931_v11, %s3001_s19 }
0x2a0b   :  { %2208 = vrot.lane.b32.xlu1 %v2205_v54, %s3001_s19 }
0x2a5d   :  { %v2303_v56 = vpop.permute.xlu1 %2302 }
0x2a5e   :  { %v2305_v58 = vadd.f32 %v2303_v56, %v2295_v55 }
0x2a60   :  { %2971 = vtanh.f32 %v2305_v58 }
0x2a61   :  { %v1384_v59 = vpop.permute.xlu1 %1383 }
0x2a62   :  { %1390 = vst.msk [vmem:[#allocation2] sm:$0x1] %vm1389_vm5, %v1384_v59 }
0x2a65   :  { %v1659_v60 = vpop.permute.xlu1 %1658 }
0x2a66   :  { %1664 = vst.msk [vmem:[#allocation2 + $0x2] sm:$0x1] %vm1389_vm5, %v1659_v60 }
0x2a69   :  { %v1933_v62 = vpop.permute.xlu1 %1932 }
0x2a6a   :  { %1938 = vst.msk [vmem:[#allocation2 + $0x4] sm:$0x1] %vm1389_vm5, %v1933_v62 }
0x2a6d   :  { %v2972_v3 = vpop.eup %2971  ;;  %v2207_v12 = vpop.permute.xlu1 %2206 }
0x2a6e   :  { %2212 = vst.msk [vmem:[#allocation2 + $0x6] sm:$0x1] %vm1389_vm5, %v2207_v12  ;;  %2308 = vrot.lane.b32.xlu0 %v2972_v3, %s3000_s0 }
0x2a71   :  { %v1386_v17 = vpop.permute.xlu1 %1385 }
0x2a72   :  { %1391 = vst.msk [vmem:[#allocation2 + $0x8] sm:$0x1] %vm1389_vm5, %v1386_v17  ;;  %1521 = vrot.lane.b32.xlu0 %v1516_v10, %s3001_s19 }
0x2a75   :  { %v1661_v20 = vpop.permute.xlu1 %1660 }
0x2a76   :  { %1665 = vst.msk [vmem:[#allocation2 + $0xa] sm:$0x1] %vm1389_vm5, %v1661_v20  ;;  %1795 = vrot.lane.b32.xlu0 %v1790_v19, %s3001_s19 }
0x2a79   :  { %v1935_v24 = vpop.permute.xlu1 %1934 }
0x2a7a   :  { %1939 = vst.msk [vmem:[#allocation2 + $0xc] sm:$0x1] %vm1389_vm5, %v1935_v24  ;;  %2069 = vrot.lane.b32.xlu0 %v2064_v57, %s3001_s19 }
0x2a7d   :  { %v2209_v1 = vpop.permute.xlu1 %2208 }
0x2a7e   :  { %2213 = vst.msk [vmem:[#allocation2 + $0xe] sm:$0x1] %vm1389_vm5, %v2209_v1  ;;  %1523 = vrot.lane.b32.xlu0 %v1520_v26, %s3001_s19 }
0x2a82   :  { %1797 = vrot.lane.b32.xlu0 %v1794_v29, %s3001_s19 }
0x2a86   :  { %2071 = vrot.lane.b32.xlu0 %v2068_v30, %s3001_s19 }
0x2ae0   :  { %v2309_v6 = vpop.permute.xlu0 %2308 }
0x2ae1   :  { %v2311_v32 = vmul.f32 %v3370_v36, %v2309_v6 }
0x2ae3   :  { %v2319_v23 = vrot.slane %v2311_v32, %v3366_v34 }
0x2ae4   :  { %v1522_v37 = vpop.permute.xlu0 %1521 }
0x2ae5   :  { %v2320_v39 = vcombine.high %v2319_v23, %v2319_v23  ;;  %v2327_v40 = vrot.slane %v2319_v23, %v3366_v34  ;;  %1527 = vst.msk [vmem:[#allocation2 + $0x1] sm:$0x1] %vm1389_vm5, %v1522_v37 }
0x2ae7   :  { %v2334_v42 = vrot.slane %v2320_v39, %v3366_v34  ;;  %v2338_v36 = vrot.slane %v2327_v40, %v3376_v41 }
0x2ae8   :  { %v1796_v43 = vpop.permute.xlu0 %1795 }
0x2ae9   :  { %1801 = vst.msk [vmem:[#allocation2 + $0x3] sm:$0x1] %vm1389_vm5, %v1796_v43  ;;  %2343 = vrot.lane.b32.xlu0 %v2338_v36, %s3001_s19  ;;  %v2342_v35 = vrot.slane %v2334_v42, %v3376_v41 }
0x2aec   :  { %v2070_v44 = vpop.permute.xlu0 %2069 }
0x2aed   :  { %2075 = vst.msk [vmem:[#allocation2 + $0x5] sm:$0x1] %vm1389_vm5, %v2070_v44  ;;  %2345 = vrot.lane.b32.xlu0 %v2342_v35, %s3001_s19 }
0x2af0   :  { %v1524_v45 = vpop.permute.xlu0 %1523 }
0x2af1   :  { %1528 = vst.msk [vmem:[#allocation2 + $0x9] sm:$0x1] %vm1389_vm5, %v1524_v45 }
0x2af4   :  { %v1798_v13 = vpop.permute.xlu0 %1797 }
0x2af5   :  { %1802 = vst.msk [vmem:[#allocation2 + $0xb] sm:$0x1] %vm1389_vm5, %v1798_v13 }
0x2af8   :  { %v2072_v34 = vpop.permute.xlu0 %2071 }
0x2af9   :  { %2076 = vst.msk [vmem:[#allocation2 + $0xd] sm:$0x1] %vm1389_vm5, %v2072_v34 }
0x2b5b   :  { %v2344_v47 = vpop.permute.xlu0 %2343 }
0x2b5c   :  { %2349 = vst.msk [vmem:[#allocation2 + $0x7] sm:$0x1] %vm1389_vm5, %v2344_v47 }
0x2b5f   :  { %v2346_v48 = vpop.permute.xlu0 %2345 }
0x2b60   :  { %2350 = vst.msk [vmem:[#allocation2 + $0xf] sm:$0x1] %vm1389_vm5, %v2346_v48 }
0x2b63   :  { %v2351_v41 = vld [vmem:[#allocation2] sm:$0xff] }
0x2b64   :  { %2770 = vmatprep.mubr.msk.f32.mxu1 %vm133_vm4, %v2351_v41 }
0x2b67   :  { %v2352_v49 = vld [vmem:[#allocation2 + $0x8] sm:$0xff] }
0x2b68   :  { %2771 = vmatmul.mubr.msk.f32.vlgmr.msra.gmra.mxu1 %vm133_vm4, %v2352_v49 }
0x2c28   :  { %v2772_v50 = vpop.f32.mrf.mxu1 }
0x2c29   :  { %v2435_v5 = vadd.f32 %v2772_v50, %v2489_v46 }
0x2c2a   :  { %v2429_v14 = vpop.f32.mrf.mxu1 }
0x2c2b   :  { %2439 = vst.msk [vmem:[%s3468_s2 + $0x8] sm:$0xff] %vm47_vm2, %v2435_v5  ;;  %v2430_v51 = vadd.f32 %v2489_v46, %v2429_v14 }
0x2c2d   :  { %2438 = vst.msk [vmem:[%s3468_s2] sm:$0xff] %vm47_vm2, %v2430_v51 }
0x2c2e   :  { %2444 = vsyncpa [#allocation4], 1 }

</bundles_post_ra>
